<compile_context>
chip_gen: v7x
topology: tpu7x:2x2x1
jax: 0.10.0
libtpu: 0.0.40
codegen_flags: <defaults>
</compile_context>

<pallas_src>
import functools

import jax
import jax.numpy as jnp
from jax import lax
from jax.experimental import pallas as pl
from jax.experimental.pallas import tpu as pltpu


# ----------------------------------------------------------------------------
# Kernel
# ----------------------------------------------------------------------------
def td_lstm_kernel(left_ref, right_ref,
                   wih_l_ref, whh_l_ref, b_l_ref,
                   wih_r_ref, whh_r_ref, b_r_ref,
                   fcw_ref, fcb_ref,
                   out_ref,
                   gxl_ref, gxr_ref):
    """Fused TD-LSTM forward (both directions in one program).

    left_ref / right_ref : (T*Bp, E) f32, time-major flattened (row = t*Bp + b)
    wih_* : (E, 4H) f32        packed gates, order i,f,g,o (4H = 128 lanes)
    whh_* : (H, 4H) bf16       true (32, 128) tile, no zero-row padding
    b_*   : (1, 4H) f32
    fcw   : (2H, Op) bf16      rows [0:H) = left half, [H:2H) = right half
    fcb   : (1, Op) f32
    out   : (Bp, Op) f32       lane-dense (Op = 128), sliced outside
    gxl/gxr : VMEM scratch (T*Bp, 4H) f32 for the hoisted input projections.
    """
    Bp = out_ref.shape[0]
    H = whh_l_ref.shape[0]
    T = left_ref.shape[0] // Bp

    # ---- Phase 1: hoisted input projections (one big MXU matmul / direction) ----
    gxl_ref[...] = (jnp.dot(left_ref[...], wih_l_ref[...],
                            preferred_element_type=jnp.float32) + b_l_ref[...])
    gxr_ref[...] = (jnp.dot(right_ref[...], wih_r_ref[...],
                            preferred_element_type=jnp.float32) + b_r_ref[...])

    def gate_math(gates, c):
        # One sigmoid + one tanh over the whole packed (Bp, 128) vreg (EUP),
        # then cheap static lane slices to pick i/f/g/o.  Gate math stays f32.
        sig = jax.nn.sigmoid(gates)
        tnh = jnp.tanh(gates)
        i = sig[:, 0 * H:1 * H]
        f = sig[:, 1 * H:2 * H]
        g = tnh[:, 2 * H:3 * H]
        o = sig[:, 3 * H:4 * H]
        c_new = f * c + i * g
        h_new = o * jnp.tanh(c_new)
        return h_new, c_new

    # ---- Phase 2: fused recurrence (both directions in one unrolled loop) ----
    def step(t, carry):
        h_l, c_l, h_r, c_r = carry
        row = pl.multiple_of(t * Bp, Bp)
        # bf16 MXU operands on the serial critical path; f32 accumulation.
        gl = gxl_ref[pl.ds(row, Bp), :] + jnp.dot(
            h_l.astype(jnp.bfloat16), whh_l_ref[...],
            preferred_element_type=jnp.float32)
        gr = gxr_ref[pl.ds(row, Bp), :] + jnp.dot(
            h_r.astype(jnp.bfloat16), whh_r_ref[...],
            preferred_element_type=jnp.float32)
        h_l, c_l = gate_math(gl, c_l)
        h_r, c_r = gate_math(gr, c_r)
        return (h_l, c_l, h_r, c_r)

    z = jnp.zeros((Bp, H), jnp.float32)
    h_l, _, h_r, _ = lax.fori_loop(0, T, step, (z, z, z, z), unroll=True)

    # ---- Phase 3: fc as two per-direction halves (no lane concat), + bias ----
    # (dropout is identity in eval mode)
    out = jnp.dot(h_l.astype(jnp.bfloat16), fcw_ref[0:H, :],
                  preferred_element_type=jnp.float32)
    out = out + jnp.dot(h_r.astype(jnp.bfloat16), fcw_ref[H:2 * H, :],
                        preferred_element_type=jnp.float32)
    out_ref[...] = out + fcb_ref[...]


# ----------------------------------------------------------------------------
# One-time weight preparation (hoisted out of the per-call path)
# ----------------------------------------------------------------------------
def prepare_params(params):
    """Re-layout / cast weights into kernel form ONCE; reuse for every call."""
    H = params["whh_l"].shape[0]
    O = params["fc_b"].shape[-1]
    Op = 128 * ((O + 127) // 128)          # lane-dense fc output columns

    fc_w = jnp.zeros((2 * H, Op), jnp.bfloat16)
    fc_w = fc_w.at[:, :O].set(params["fc_w"].astype(jnp.bfloat16))
    fc_b = jnp.zeros((1, Op), jnp.float32)
    fc_b = fc_b.at[:, :O].set(params["fc_b"].astype(jnp.float32))

    return {
        "embedding": params["embedding"].astype(jnp.float32),
        # Input projections: full f32 precision (E = 300 contraction).
        "wih_l": params["wih_l"].astype(jnp.float32),     # (E, 4H) packed
        "wih_r": params["wih_r"].astype(jnp.float32),
        # Recurrence weights: bf16 on the serial critical path.
        "whh_l": params["whh_l"].astype(jnp.bfloat16),    # (H, 4H)
        "whh_r": params["whh_r"].astype(jnp.bfloat16),
        "b_l": params["b_l"].astype(jnp.float32),         # (1, 4H)
        "b_r": params["b_r"].astype(jnp.float32),
        "fc_w": fc_w,                                     # (2H, Op) bf16
        "fc_b": fc_b,                                     # (1, Op)  f32
    }


# ----------------------------------------------------------------------------
# Forward wrapper (per-call glue: embedding gather, flip, batch padding)
# ----------------------------------------------------------------------------
@functools.partial(jax.jit, static_argnames=("output_dim",))
def td_lstm_forward(left_idx, right_idx, prepped, *, output_dim):
    emb = prepped["embedding"]
    B, T = left_idx.shape
    E = emb.shape[1]
    H = prepped["whh_l"].shape[0]
    Op = prepped["fc_w"].shape[1]
    Bp = max(8, ((B + 7) // 8) * 8)        # sublane-friendly batch

    # TODO(synk): embedding gather + torch.flip are data-dependent gathers left
    # to XLA in the wrapper; they have no cheap rectangular-tile Pallas form.
    left_e = emb[left_idx]                                  # (B, T, E)
    right_e = jnp.flip(emb[right_idx], axis=1)              # torch.flip(dims=[1])

    def to_kernel_layout(x_bte):
        x = jnp.pad(x_bte, ((0, Bp - B), (0, 0), (0, 0)))   # zero-pad batch
        x = jnp.transpose(x, (1, 0, 2))                     # (T, Bp, E)
        return x.reshape(T * Bp, E)                         # row = t*Bp + b

    left2d = to_kernel_layout(left_e)
    right2d = to_kernel_layout(right_e)

    vmem = pl.BlockSpec(memory_space=pltpu.MemorySpace.VMEM)
    out_p = pl.pallas_call(
        td_lstm_kernel,
        out_shape=jax.ShapeDtypeStruct((Bp, Op), jnp.float32),
        in_specs=[vmem] * 10,
        out_specs=vmem,
        scratch_shapes=[pltpu.VMEM((T * Bp, 4 * H), jnp.float32),
                        pltpu.VMEM((T * Bp, 4 * H), jnp.float32)],
    )(left2d, right2d,
      prepped["wih_l"], prepped["whh_l"], prepped["b_l"],
      prepped["wih_r"], prepped["whh_r"], prepped["b_r"],
      prepped["fc_w"], prepped["fc_b"])

    return out_p[:B, :output_dim]


# ----------------------------------------------------------------------------
# Pure-JAX reference (mirrors PyTorch eval-mode semantics, full f32)
# ----------------------------------------------------------------------------
def td_lstm_reference(left_idx, right_idx, params):
    emb = params["embedding"].astype(jnp.float32)
    left_e = emb[left_idx]
    right_e = jnp.flip(emb[right_idx], axis=1)
    hp = lax.Precision.HIGHEST

    def run_lstm(x_bte, wih, whh, b):
        B, T, _ = x_bte.shape
        H = whh.shape[0]
        h = jnp.zeros((B, H), jnp.float32)
        c = jnp.zeros((B, H), jnp.float32)
        for t in range(T):
            gates = (jnp.dot(x_bte[:, t, :], wih, precision=hp)
                     + jnp.dot(h, whh, precision=hp) + b)
            i = jax.nn.sigmoid(gates[:, 0:H])
            f = jax.nn.sigmoid(gates[:, H:2 * H])
            g = jnp.tanh(gates[:, 2 * H:3 * H])
            o = jax.nn.sigmoid(gates[:, 3 * H:4 * H])
            c = f * c + i * g
            h = o * jnp.tanh(c)
        return h

    hl = run_lstm(left_e, params["wih_l"], params["whh_l"], params["b_l"])
    hr = run_lstm(right_e, params["wih_r"], params["whh_r"], params["b_r"])
    ctx = jnp.concatenate([hl, hr], axis=1)
    return jnp.dot(ctx, params["fc_w"], precision=hp) + params["fc_b"]


# ----------------------------------------------------------------------------
# Params
# ----------------------------------------------------------------------------
def init_params(key, vocab_size, embed_dim, hidden_dim, output_dim):
    ks = jax.random.split(key, 12)
    bound = 1.0 / jnp.sqrt(hidden_dim)

    def unif(k, shape):
        return jax.random.uniform(k, shape, jnp.float32, -bound, bound)

    return {
        "embedding": jax.random.normal(ks[0], (vocab_size, embed_dim), jnp.float32),
        # Left LSTM (weights pre-transposed: (in, 4H) / (H, 4H); gate order i,f,g,o)
        "wih_l": unif(ks[1], (embed_dim, 4 * hidden_dim)),
        "whh_l": unif(ks[2], (hidden_dim, 4 * hidden_dim)),
        "b_l": unif(ks[3], (1, 4 * hidden_dim)) + unif(ks[4], (1, 4 * hidden_dim)),
        # Right LSTM (input_size = 300 == embed_dim)
        "wih_r": unif(ks[5], (embed_dim, 4 * hidden_dim)),
        "whh_r": unif(ks[6], (hidden_dim, 4 * hidden_dim)),
        "b_r": unif(ks[7], (1, 4 * hidden_dim)) + unif(ks[8], (1, 4 * hidden_dim)),
        # fc: (hidden_dim * 2) -> output_dim (non-bidirectional case)
        "fc_w": unif(ks[9], (2 * hidden_dim, output_dim)),
        "fc_b": unif(ks[10], (1, output_dim)),
    }


if __name__ == "__main__":
    VOCAB = 50
    EMBED_DIM = 300        # fixed by module (lstm_right input_size=300)
    HIDDEN_DIM = 32
    OUTPUT_DIM = 3
    BATCH = 2
    SEQ = 8

    key = jax.random.PRNGKey(0)
    k_par, k_l, k_r = jax.random.split(key, 3)

    params = init_params(k_par, VOCAB, EMBED_DIM, HIDDEN_DIM, OUTPUT_DIM)
    left_idx = jax.random.randint(k_l, (BATCH, SEQ), 0, VOCAB, dtype=jnp.int32)
    right_idx = jax.random.randint(k_r, (BATCH, SEQ), 0, VOCAB, dtype=jnp.int32)

    # Weight re-layout / casts run once, outside the per-call path.
    prepped = jax.tree_util.tree_map(jax.block_until_ready, prepare_params(params))

    out = td_lstm_forward(left_idx, right_idx, prepped, output_dim=OUTPUT_DIM)
    out = jax.block_until_ready(out)

    ref = td_lstm_reference(left_idx, right_idx, params)
    assert out.shape == (BATCH, OUTPUT_DIM)
    # Tolerance reflects bf16 recurrence/fc weights in the kernel (per perf
    # feedback); structural bugs produce errors orders of magnitude larger.
    err = float(jnp.max(jnp.abs(out - ref)))
    assert jnp.allclose(out, ref, rtol=3e-2, atol=3e-2), f"kernel != reference (max |diff| = {err})"

    print("KERNEL_OK")
</pallas_src>

<mosaic_0001>
module attributes {stable_mosaic.version = 11 : i64} {
  func.func @td_lstm_kernel(%arg0: memref<64x300xf32, #tpu.memory_space<vmem>>, %arg1: memref<64x300xf32, #tpu.memory_space<vmem>>, %arg2: memref<300x128xf32, #tpu.memory_space<vmem>>, %arg3: memref<32x128xbf16, #tpu.memory_space<vmem>>, %arg4: memref<1x128xf32, #tpu.memory_space<vmem>>, %arg5: memref<300x128xf32, #tpu.memory_space<vmem>>, %arg6: memref<32x128xbf16, #tpu.memory_space<vmem>>, %arg7: memref<1x128xf32, #tpu.memory_space<vmem>>, %arg8: memref<64x128xbf16, #tpu.memory_space<vmem>>, %arg9: memref<1x128xf32, #tpu.memory_space<vmem>>, %arg10: memref<8x128xf32, #tpu.memory_space<vmem>>, %arg11: memref<64x128xf32, #tpu.memory_space<vmem>>, %arg12: memref<64x128xf32, #tpu.memory_space<vmem>>) attributes {dimension_semantics = [], scalar_prefetch = 0 : i64, scratch_operands = 2 : i64, tpu.core_type = #tpu.core_type<tc>} {
    %c0 = arith.constant 0 : index
    %c0_0 = arith.constant 0 : index
    %0 = vector.load %arg0[%c0, %c0_0] : memref<64x300xf32, #tpu.memory_space<vmem>>, vector<64x300xf32>
    %c0_1 = arith.constant 0 : index
    %c0_2 = arith.constant 0 : index
    %1 = vector.load %arg2[%c0_1, %c0_2] : memref<300x128xf32, #tpu.memory_space<vmem>>, vector<300x128xf32>
    %cst = arith.constant dense<0.000000e+00> : vector<64x128xf32>
    %2 = tpu.matmul %0, %1, %cst {dimension_numbers = #tpu.dot_dimension_numbers<[1], [0], [0], [1], [0, 0, 1, 1], [], []>} : vector<64x300xf32>, vector<300x128xf32>, vector<64x128xf32> -> vector<64x128xf32>
    %c0_3 = arith.constant 0 : index
    %c0_4 = arith.constant 0 : index
    %3 = vector.load %arg4[%c0_3, %c0_4] : memref<1x128xf32, #tpu.memory_space<vmem>>, vector<1x128xf32>
    %4 = vector.broadcast %3 : vector<1x128xf32> to vector<64x128xf32>
    %5 = arith.addf %2, %4 : vector<64x128xf32>
    %c0_5 = arith.constant 0 : index
    %c0_6 = arith.constant 0 : index
    %6 = vector.load %arg11[%c0_5, %c0_6] : memref<64x128xf32, #tpu.memory_space<vmem>>, vector<64x128xf32>
    tpu.vector_store %arg11[%c0_5, %c0_6], %5 {strides = array<i32>} : memref<64x128xf32, #tpu.memory_space<vmem>>, vector<64x128xf32>,
    %c0_7 = arith.constant 0 : index
    %c0_8 = arith.constant 0 : index
    %7 = vector.load %arg1[%c0_7, %c0_8] : memref<64x300xf32, #tpu.memory_space<vmem>>, vector<64x300xf32>
    %c0_9 = arith.constant 0 : index
    %c0_10 = arith.constant 0 : index
    %8 = vector.load %arg5[%c0_9, %c0_10] : memref<300x128xf32, #tpu.memory_space<vmem>>, vector<300x128xf32>
    %cst_11 = arith.constant dense<0.000000e+00> : vector<64x128xf32>
    %9 = tpu.matmul %7, %8, %cst_11 {dimension_numbers = #tpu.dot_dimension_numbers<[1], [0], [0], [1], [0, 0, 1, 1], [], []>} : vector<64x300xf32>, vector<300x128xf32>, vector<64x128xf32> -> vector<64x128xf32>
    %c0_12 = arith.constant 0 : index
    %c0_13 = arith.constant 0 : index
    %10 = vector.load %arg7[%c0_12, %c0_13] : memref<1x128xf32, #tpu.memory_space<vmem>>, vector<1x128xf32>
    %11 = vector.broadcast %10 : vector<1x128xf32> to vector<64x128xf32>
    %12 = arith.addf %9, %11 : vector<64x128xf32>
    %c0_14 = arith.constant 0 : index
    %c0_15 = arith.constant 0 : index
    %13 = vector.load %arg12[%c0_14, %c0_15] : memref<64x128xf32, #tpu.memory_space<vmem>>, vector<64x128xf32>
    tpu.vector_store %arg12[%c0_14, %c0_15], %12 {strides = array<i32>} : memref<64x128xf32, #tpu.memory_space<vmem>>, vector<64x128xf32>,
    %cst_16 = arith.constant 0.000000e+00 : f32
    %14 = vector.broadcast %cst_16 : f32 to vector<8x32xf32>
    %c0_i32 = arith.constant 0 : i32
    %c8_i32 = arith.constant 8 : i32
    %15 = arith.muli %c0_i32, %c8_i32 : i32
    %16 = tpu.assume_multiple %15, 8 : i32
    %17 = arith.index_cast %16 : i32 to index
    %c0_17 = arith.constant 0 : index
    %18 = vector.load %arg11[%17, %c0_17] : memref<64x128xf32, #tpu.memory_space<vmem>>, vector<8x128xf32>
    %19 = arith.truncf %14 : vector<8x32xf32> to vector<8x32xbf16>
    %c0_18 = arith.constant 0 : index
    %c0_19 = arith.constant 0 : index
    %20 = vector.load %arg3[%c0_18, %c0_19] : memref<32x128xbf16, #tpu.memory_space<vmem>>, vector<32x128xbf16>
    %cst_20 = arith.constant dense<0.000000e+00> : vector<8x128xf32>
    %21 = tpu.matmul %19, %20, %cst_20 {dimension_numbers = #tpu.dot_dimension_numbers<[1], [0], [0], [1], [0, 0, 1, 1], [], []>} : vector<8x32xbf16>, vector<32x128xbf16>, vector<8x128xf32> -> vector<8x128xf32>
    %22 = arith.addf %18, %21 : vector<8x128xf32>
    %23 = arith.index_cast %16 : i32 to index
    %c0_21 = arith.constant 0 : index
    %24 = vector.load %arg12[%23, %c0_21] : memref<64x128xf32, #tpu.memory_space<vmem>>, vector<8x128xf32>
    %25 = arith.truncf %14 : vector<8x32xf32> to vector<8x32xbf16>
    %c0_22 = arith.constant 0 : index
    %c0_23 = arith.constant 0 : index
    %26 = vector.load %arg6[%c0_22, %c0_23] : memref<32x128xbf16, #tpu.memory_space<vmem>>, vector<32x128xbf16>
    %cst_24 = arith.constant dense<0.000000e+00> : vector<8x128xf32>
    %27 = tpu.matmul %25, %26, %cst_24 {dimension_numbers = #tpu.dot_dimension_numbers<[1], [0], [0], [1], [0, 0, 1, 1], [], []>} : vector<8x32xbf16>, vector<32x128xbf16>, vector<8x128xf32> -> vector<8x128xf32>
    %28 = arith.addf %24, %27 : vector<8x128xf32>
    %29 = arith.negf %22 : vector<8x128xf32>
    %30 = math.exp %29 : vector<8x128xf32>
    %cst_25 = arith.constant 1.000000e+00 : f32
    %31 = vector.broadcast %cst_25 : f32 to vector<8x128xf32>
    %32 = arith.addf %31, %30 : vector<8x128xf32>
    %33 = arith.divf %31, %32 : vector<8x128xf32>
    %34 = math.tanh %22 : vector<8x128xf32>
    %35 = vector.extract_strided_slice %33 {offsets = [0, 0], sizes = [8, 32], strides = [1, 1]} : vector<8x128xf32> to vector<8x32xf32>
    %36 = vector.extract_strided_slice %33 {offsets = [0, 32], sizes = [8, 32], strides = [1, 1]} : vector<8x128xf32> to vector<8x32xf32>
    %37 = vector.extract_strided_slice %34 {offsets = [0, 64], sizes = [8, 32], strides = [1, 1]} : vector<8x128xf32> to vector<8x32xf32>
    %38 = vector.extract_strided_slice %33 {offsets = [0, 96], sizes = [8, 32], strides = [1, 1]} : vector<8x128xf32> to vector<8x32xf32>
    %39 = arith.mulf %36, %14 : vector<8x32xf32>
    %40 = arith.mulf %35, %37 : vector<8x32xf32>
    %41 = arith.addf %39, %40 : vector<8x32xf32>
    %42 = math.tanh %41 : vector<8x32xf32>
    %43 = arith.mulf %38, %42 : vector<8x32xf32>
    %44 = arith.negf %28 : vector<8x128xf32>
    %45 = math.exp %44 : vector<8x128xf32>
    %cst_26 = arith.constant 1.000000e+00 : f32
    %46 = vector.broadcast %cst_26 : f32 to vector<8x128xf32>
    %47 = arith.addf %46, %45 : vector<8x128xf32>
    %48 = arith.divf %46, %47 : vector<8x128xf32>
    %49 = math.tanh %28 : vector<8x128xf32>
    %50 = vector.extract_strided_slice %48 {offsets = [0, 0], sizes = [8, 32], strides = [1, 1]} : vector<8x128xf32> to vector<8x32xf32>
    %51 = vector.extract_strided_slice %48 {offsets = [0, 32], sizes = [8, 32], strides = [1, 1]} : vector<8x128xf32> to vector<8x32xf32>
    %52 = vector.extract_strided_slice %49 {offsets = [0, 64], sizes = [8, 32], strides = [1, 1]} : vector<8x128xf32> to vector<8x32xf32>
    %53 = vector.extract_strided_slice %48 {offsets = [0, 96], sizes = [8, 32], strides = [1, 1]} : vector<8x128xf32> to vector<8x32xf32>
    %54 = arith.mulf %51, %14 : vector<8x32xf32>
    %55 = arith.mulf %50, %52 : vector<8x32xf32>
    %56 = arith.addf %54, %55 : vector<8x32xf32>
    %57 = math.tanh %56 : vector<8x32xf32>
    %58 = arith.mulf %53, %57 : vector<8x32xf32>
    %c1_i32 = arith.constant 1 : i32
    %c8_i32_27 = arith.constant 8 : i32
    %59 = arith.muli %c1_i32, %c8_i32_27 : i32
    %60 = tpu.assume_multiple %59, 8 : i32
    %61 = arith.index_cast %60 : i32 to index
    %c0_28 = arith.constant 0 : index
    %62 = vector.load %arg11[%61, %c0_28] : memref<64x128xf32, #tpu.memory_space<vmem>>, vector<8x128xf32>
    %63 = arith.truncf %43 : vector<8x32xf32> to vector<8x32xbf16>
    %c0_29 = arith.constant 0 : index
    %c0_30 = arith.constant 0 : index
    %64 = vector.load %arg3[%c0_29, %c0_30] : memref<32x128xbf16, #tpu.memory_space<vmem>>, vector<32x128xbf16>
    %cst_31 = arith.constant dense<0.000000e+00> : vector<8x128xf32>
    %65 = tpu.matmul %63, %64, %cst_31 {dimension_numbers = #tpu.dot_dimension_numbers<[1], [0], [0], [1], [0, 0, 1, 1], [], []>} : vector<8x32xbf16>, vector<32x128xbf16>, vector<8x128xf32> -> vector<8x128xf32>
    %66 = arith.addf %62, %65 : vector<8x128xf32>
    %67 = arith.index_cast %60 : i32 to index
    %c0_32 = arith.constant 0 : index
    %68 = vector.load %arg12[%67, %c0_32] : memref<64x128xf32, #tpu.memory_space<vmem>>, vector<8x128xf32>
    %69 = arith.truncf %58 : vector<8x32xf32> to vector<8x32xbf16>
    %c0_33 = arith.constant 0 : index
    %c0_34 = arith.constant 0 : index
    %70 = vector.load %arg6[%c0_33, %c0_34] : memref<32x128xbf16, #tpu.memory_space<vmem>>, vector<32x128xbf16>
    %cst_35 = arith.constant dense<0.000000e+00> : vector<8x128xf32>
    %71 = tpu.matmul %69, %70, %cst_35 {dimension_numbers = #tpu.dot_dimension_numbers<[1], [0], [0], [1], [0, 0, 1, 1], [], []>} : vector<8x32xbf16>, vector<32x128xbf16>, vector<8x128xf32> -> vector<8x128xf32>
    %72 = arith.addf %68, %71 : vector<8x128xf32>
    %73 = arith.negf %66 : vector<8x128xf32>
    %74 = math.exp %73 : vector<8x128xf32>
    %cst_36 = arith.constant 1.000000e+00 : f32
    %75 = vector.broadcast %cst_36 : f32 to vector<8x128xf32>
    %76 = arith.addf %75, %74 : vector<8x128xf32>
    %77 = arith.divf %75, %76 : vector<8x128xf32>
    %78 = math.tanh %66 : vector<8x128xf32>
    %79 = vector.extract_strided_slice %77 {offsets = [0, 0], sizes = [8, 32], strides = [1, 1]} : vector<8x128xf32> to vector<8x32xf32>
    %80 = vector.extract_strided_slice %77 {offsets = [0, 32], sizes = [8, 32], strides = [1, 1]} : vector<8x128xf32> to vector<8x32xf32>
    %81 = vector.extract_strided_slice %78 {offsets = [0, 64], sizes = [8, 32], strides = [1, 1]} : vector<8x128xf32> to vector<8x32xf32>
    %82 = vector.extract_strided_slice %77 {offsets = [0, 96], sizes = [8, 32], strides = [1, 1]} : vector<8x128xf32> to vector<8x32xf32>
    %83 = arith.mulf %80, %41 : vector<8x32xf32>
    %84 = arith.mulf %79, %81 : vector<8x32xf32>
    %85 = arith.addf %83, %84 : vector<8x32xf32>
    %86 = math.tanh %85 : vector<8x32xf32>
    %87 = arith.mulf %82, %86 : vector<8x32xf32>
    %88 = arith.negf %72 : vector<8x128xf32>
    %89 = math.exp %88 : vector<8x128xf32>
    %cst_37 = arith.constant 1.000000e+00 : f32
    %90 = vector.broadcast %cst_37 : f32 to vector<8x128xf32>
    %91 = arith.addf %90, %89 : vector<8x128xf32>
    %92 = arith.divf %90, %91 : vector<8x128xf32>
    %93 = math.tanh %72 : vector<8x128xf32>
    %94 = vector.extract_strided_slice %92 {offsets = [0, 0], sizes = [8, 32], strides = [1, 1]} : vector<8x128xf32> to vector<8x32xf32>
    %95 = vector.extract_strided_slice %92 {offsets = [0, 32], sizes = [8, 32], strides = [1, 1]} : vector<8x128xf32> to vector<8x32xf32>
    %96 = vector.extract_strided_slice %93 {offsets = [0, 64], sizes = [8, 32], strides = [1, 1]} : vector<8x128xf32> to vector<8x32xf32>
    %97 = vector.extract_strided_slice %92 {offsets = [0, 96], sizes = [8, 32], strides = [1, 1]} : vector<8x128xf32> to vector<8x32xf32>
    %98 = arith.mulf %95, %56 : vector<8x32xf32>
    %99 = arith.mulf %94, %96 : vector<8x32xf32>
    %100 = arith.addf %98, %99 : vector<8x32xf32>
    %101 = math.tanh %100 : vector<8x32xf32>
    %102 = arith.mulf %97, %101 : vector<8x32xf32>
    %c2_i32 = arith.constant 2 : i32
    %c8_i32_38 = arith.constant 8 : i32
    %103 = arith.muli %c2_i32, %c8_i32_38 : i32
    %104 = tpu.assume_multiple %103, 8 : i32
    %105 = arith.index_cast %104 : i32 to index
    %c0_39 = arith.constant 0 : index
    %106 = vector.load %arg11[%105, %c0_39] : memref<64x128xf32, #tpu.memory_space<vmem>>, vector<8x128xf32>
    %107 = arith.truncf %87 : vector<8x32xf32> to vector<8x32xbf16>
    %c0_40 = arith.constant 0 : index
    %c0_41 = arith.constant 0 : index
    %108 = vector.load %arg3[%c0_40, %c0_41] : memref<32x128xbf16, #tpu.memory_space<vmem>>, vector<32x128xbf16>
    %cst_42 = arith.constant dense<0.000000e+00> : vector<8x128xf32>
    %109 = tpu.matmul %107, %108, %cst_42 {dimension_numbers = #tpu.dot_dimension_numbers<[1], [0], [0], [1], [0, 0, 1, 1], [], []>} : vector<8x32xbf16>, vector<32x128xbf16>, vector<8x128xf32> -> vector<8x128xf32>
    %110 = arith.addf %106, %109 : vector<8x128xf32>
    %111 = arith.index_cast %104 : i32 to index
    %c0_43 = arith.constant 0 : index
    %112 = vector.load %arg12[%111, %c0_43] : memref<64x128xf32, #tpu.memory_space<vmem>>, vector<8x128xf32>
    %113 = arith.truncf %102 : vector<8x32xf32> to vector<8x32xbf16>
    %c0_44 = arith.constant 0 : index
    %c0_45 = arith.constant 0 : index
    %114 = vector.load %arg6[%c0_44, %c0_45] : memref<32x128xbf16, #tpu.memory_space<vmem>>, vector<32x128xbf16>
    %cst_46 = arith.constant dense<0.000000e+00> : vector<8x128xf32>
    %115 = tpu.matmul %113, %114, %cst_46 {dimension_numbers = #tpu.dot_dimension_numbers<[1], [0], [0], [1], [0, 0, 1, 1], [], []>} : vector<8x32xbf16>, vector<32x128xbf16>, vector<8x128xf32> -> vector<8x128xf32>
    %116 = arith.addf %112, %115 : vector<8x128xf32>
    %117 = arith.negf %110 : vector<8x128xf32>
    %118 = math.exp %117 : vector<8x128xf32>
    %cst_47 = arith.constant 1.000000e+00 : f32
    %119 = vector.broadcast %cst_47 : f32 to vector<8x128xf32>
    %120 = arith.addf %119, %118 : vector<8x128xf32>
    %121 = arith.divf %119, %120 : vector<8x128xf32>
    %122 = math.tanh %110 : vector<8x128xf32>
    %123 = vector.extract_strided_slice %121 {offsets = [0, 0], sizes = [8, 32], strides = [1, 1]} : vector<8x128xf32> to vector<8x32xf32>
    %124 = vector.extract_strided_slice %121 {offsets = [0, 32], sizes = [8, 32], strides = [1, 1]} : vector<8x128xf32> to vector<8x32xf32>
    %125 = vector.extract_strided_slice %122 {offsets = [0, 64], sizes = [8, 32], strides = [1, 1]} : vector<8x128xf32> to vector<8x32xf32>
    %126 = vector.extract_strided_slice %121 {offsets = [0, 96], sizes = [8, 32], strides = [1, 1]} : vector<8x128xf32> to vector<8x32xf32>
    %127 = arith.mulf %124, %85 : vector<8x32xf32>
    %128 = arith.mulf %123, %125 : vector<8x32xf32>
    %129 = arith.addf %127, %128 : vector<8x32xf32>
    %130 = math.tanh %129 : vector<8x32xf32>
    %131 = arith.mulf %126, %130 : vector<8x32xf32>
    %132 = arith.negf %116 : vector<8x128xf32>
    %133 = math.exp %132 : vector<8x128xf32>
    %cst_48 = arith.constant 1.000000e+00 : f32
    %134 = vector.broadcast %cst_48 : f32 to vector<8x128xf32>
    %135 = arith.addf %134, %133 : vector<8x128xf32>
    %136 = arith.divf %134, %135 : vector<8x128xf32>
    %137 = math.tanh %116 : vector<8x128xf32>
    %138 = vector.extract_strided_slice %136 {offsets = [0, 0], sizes = [8, 32], strides = [1, 1]} : vector<8x128xf32> to vector<8x32xf32>
    %139 = vector.extract_strided_slice %136 {offsets = [0, 32], sizes = [8, 32], strides = [1, 1]} : vector<8x128xf32> to vector<8x32xf32>
    %140 = vector.extract_strided_slice %137 {offsets = [0, 64], sizes = [8, 32], strides = [1, 1]} : vector<8x128xf32> to vector<8x32xf32>
    %141 = vector.extract_strided_slice %136 {offsets = [0, 96], sizes = [8, 32], strides = [1, 1]} : vector<8x128xf32> to vector<8x32xf32>
    %142 = arith.mulf %139, %100 : vector<8x32xf32>
    %143 = arith.mulf %138, %140 : vector<8x32xf32>
    %144 = arith.addf %142, %143 : vector<8x32xf32>
    %145 = math.tanh %144 : vector<8x32xf32>
    %146 = arith.mulf %141, %145 : vector<8x32xf32>
    %c3_i32 = arith.constant 3 : i32
    %c8_i32_49 = arith.constant 8 : i32
    %147 = arith.muli %c3_i32, %c8_i32_49 : i32
    %148 = tpu.assume_multiple %147, 8 : i32
    %149 = arith.index_cast %148 : i32 to index
    %c0_50 = arith.constant 0 : index
    %150 = vector.load %arg11[%149, %c0_50] : memref<64x128xf32, #tpu.memory_space<vmem>>, vector<8x128xf32>
    %151 = arith.truncf %131 : vector<8x32xf32> to vector<8x32xbf16>
    %c0_51 = arith.constant 0 : index
    %c0_52 = arith.constant 0 : index
    %152 = vector.load %arg3[%c0_51, %c0_52] : memref<32x128xbf16, #tpu.memory_space<vmem>>, vector<32x128xbf16>
    %cst_53 = arith.constant dense<0.000000e+00> : vector<8x128xf32>
    %153 = tpu.matmul %151, %152, %cst_53 {dimension_numbers = #tpu.dot_dimension_numbers<[1], [0], [0], [1], [0, 0, 1, 1], [], []>} : vector<8x32xbf16>, vector<32x128xbf16>, vector<8x128xf32> -> vector<8x128xf32>
    %154 = arith.addf %150, %153 : vector<8x128xf32>
    %155 = arith.index_cast %148 : i32 to index
    %c0_54 = arith.constant 0 : index
    %156 = vector.load %arg12[%155, %c0_54] : memref<64x128xf32, #tpu.memory_space<vmem>>, vector<8x128xf32>
    %157 = arith.truncf %146 : vector<8x32xf32> to vector<8x32xbf16>
    %c0_55 = arith.constant 0 : index
    %c0_56 = arith.constant 0 : index
    %158 = vector.load %arg6[%c0_55, %c0_56] : memref<32x128xbf16, #tpu.memory_space<vmem>>, vector<32x128xbf16>
    %cst_57 = arith.constant dense<0.000000e+00> : vector<8x128xf32>
    %159 = tpu.matmul %157, %158, %cst_57 {dimension_numbers = #tpu.dot_dimension_numbers<[1], [0], [0], [1], [0, 0, 1, 1], [], []>} : vector<8x32xbf16>, vector<32x128xbf16>, vector<8x128xf32> -> vector<8x128xf32>
    %160 = arith.addf %156, %159 : vector<8x128xf32>
    %161 = arith.negf %154 : vector<8x128xf32>
    %162 = math.exp %161 : vector<8x128xf32>
    %cst_58 = arith.constant 1.000000e+00 : f32
    %163 = vector.broadcast %cst_58 : f32 to vector<8x128xf32>
    %164 = arith.addf %163, %162 : vector<8x128xf32>
    %165 = arith.divf %163, %164 : vector<8x128xf32>
    %166 = math.tanh %154 : vector<8x128xf32>
    %167 = vector.extract_strided_slice %165 {offsets = [0, 0], sizes = [8, 32], strides = [1, 1]} : vector<8x128xf32> to vector<8x32xf32>
    %168 = vector.extract_strided_slice %165 {offsets = [0, 32], sizes = [8, 32], strides = [1, 1]} : vector<8x128xf32> to vector<8x32xf32>
    %169 = vector.extract_strided_slice %166 {offsets = [0, 64], sizes = [8, 32], strides = [1, 1]} : vector<8x128xf32> to vector<8x32xf32>
    %170 = vector.extract_strided_slice %165 {offsets = [0, 96], sizes = [8, 32], strides = [1, 1]} : vector<8x128xf32> to vector<8x32xf32>
    %171 = arith.mulf %168, %129 : vector<8x32xf32>
    %172 = arith.mulf %167, %169 : vector<8x32xf32>
    %173 = arith.addf %171, %172 : vector<8x32xf32>
    %174 = math.tanh %173 : vector<8x32xf32>
    %175 = arith.mulf %170, %174 : vector<8x32xf32>
    %176 = arith.negf %160 : vector<8x128xf32>
    %177 = math.exp %176 : vector<8x128xf32>
    %cst_59 = arith.constant 1.000000e+00 : f32
    %178 = vector.broadcast %cst_59 : f32 to vector<8x128xf32>
    %179 = arith.addf %178, %177 : vector<8x128xf32>
    %180 = arith.divf %178, %179 : vector<8x128xf32>
    %181 = math.tanh %160 : vector<8x128xf32>
    %182 = vector.extract_strided_slice %180 {offsets = [0, 0], sizes = [8, 32], strides = [1, 1]} : vector<8x128xf32> to vector<8x32xf32>
    %183 = vector.extract_strided_slice %180 {offsets = [0, 32], sizes = [8, 32], strides = [1, 1]} : vector<8x128xf32> to vector<8x32xf32>
    %184 = vector.extract_strided_slice %181 {offsets = [0, 64], sizes = [8, 32], strides = [1, 1]} : vector<8x128xf32> to vector<8x32xf32>
    %185 = vector.extract_strided_slice %180 {offsets = [0, 96], sizes = [8, 32], strides = [1, 1]} : vector<8x128xf32> to vector<8x32xf32>
    %186 = arith.mulf %183, %144 : vector<8x32xf32>
    %187 = arith.mulf %182, %184 : vector<8x32xf32>
    %188 = arith.addf %186, %187 : vector<8x32xf32>
    %189 = math.tanh %188 : vector<8x32xf32>
    %190 = arith.mulf %185, %189 : vector<8x32xf32>
    %c4_i32 = arith.constant 4 : i32
    %c8_i32_60 = arith.constant 8 : i32
    %191 = arith.muli %c4_i32, %c8_i32_60 : i32
    %192 = tpu.assume_multiple %191, 8 : i32
    %193 = arith.index_cast %192 : i32 to index
    %c0_61 = arith.constant 0 : index
    %194 = vector.load %arg11[%193, %c0_61] : memref<64x128xf32, #tpu.memory_space<vmem>>, vector<8x128xf32>
    %195 = arith.truncf %175 : vector<8x32xf32> to vector<8x32xbf16>
    %c0_62 = arith.constant 0 : index
    %c0_63 = arith.constant 0 : index
    %196 = vector.load %arg3[%c0_62, %c0_63] : memref<32x128xbf16, #tpu.memory_space<vmem>>, vector<32x128xbf16>
    %cst_64 = arith.constant dense<0.000000e+00> : vector<8x128xf32>
    %197 = tpu.matmul %195, %196, %cst_64 {dimension_numbers = #tpu.dot_dimension_numbers<[1], [0], [0], [1], [0, 0, 1, 1], [], []>} : vector<8x32xbf16>, vector<32x128xbf16>, vector<8x128xf32> -> vector<8x128xf32>
    %198 = arith.addf %194, %197 : vector<8x128xf32>
    %199 = arith.index_cast %192 : i32 to index
    %c0_65 = arith.constant 0 : index
    %200 = vector.load %arg12[%199, %c0_65] : memref<64x128xf32, #tpu.memory_space<vmem>>, vector<8x128xf32>
    %201 = arith.truncf %190 : vector<8x32xf32> to vector<8x32xbf16>
    %c0_66 = arith.constant 0 : index
    %c0_67 = arith.constant 0 : index
    %202 = vector.load %arg6[%c0_66, %c0_67] : memref<32x128xbf16, #tpu.memory_space<vmem>>, vector<32x128xbf16>
    %cst_68 = arith.constant dense<0.000000e+00> : vector<8x128xf32>
    %203 = tpu.matmul %201, %202, %cst_68 {dimension_numbers = #tpu.dot_dimension_numbers<[1], [0], [0], [1], [0, 0, 1, 1], [], []>} : vector<8x32xbf16>, vector<32x128xbf16>, vector<8x128xf32> -> vector<8x128xf32>
    %204 = arith.addf %200, %203 : vector<8x128xf32>
    %205 = arith.negf %198 : vector<8x128xf32>
    %206 = math.exp %205 : vector<8x128xf32>
    %cst_69 = arith.constant 1.000000e+00 : f32
    %207 = vector.broadcast %cst_69 : f32 to vector<8x128xf32>
    %208 = arith.addf %207, %206 : vector<8x128xf32>
    %209 = arith.divf %207, %208 : vector<8x128xf32>
    %210 = math.tanh %198 : vector<8x128xf32>
    %211 = vector.extract_strided_slice %209 {offsets = [0, 0], sizes = [8, 32], strides = [1, 1]} : vector<8x128xf32> to vector<8x32xf32>
    %212 = vector.extract_strided_slice %209 {offsets = [0, 32], sizes = [8, 32], strides = [1, 1]} : vector<8x128xf32> to vector<8x32xf32>
    %213 = vector.extract_strided_slice %210 {offsets = [0, 64], sizes = [8, 32], strides = [1, 1]} : vector<8x128xf32> to vector<8x32xf32>
    %214 = vector.extract_strided_slice %209 {offsets = [0, 96], sizes = [8, 32], strides = [1, 1]} : vector<8x128xf32> to vector<8x32xf32>
    %215 = arith.mulf %212, %173 : vector<8x32xf32>
    %216 = arith.mulf %211, %213 : vector<8x32xf32>
    %217 = arith.addf %215, %216 : vector<8x32xf32>
    %218 = math.tanh %217 : vector<8x32xf32>
    %219 = arith.mulf %214, %218 : vector<8x32xf32>
    %220 = arith.negf %204 : vector<8x128xf32>
    %221 = math.exp %220 : vector<8x128xf32>
    %cst_70 = arith.constant 1.000000e+00 : f32
    %222 = vector.broadcast %cst_70 : f32 to vector<8x128xf32>
    %223 = arith.addf %222, %221 : vector<8x128xf32>
    %224 = arith.divf %222, %223 : vector<8x128xf32>
    %225 = math.tanh %204 : vector<8x128xf32>
    %226 = vector.extract_strided_slice %224 {offsets = [0, 0], sizes = [8, 32], strides = [1, 1]} : vector<8x128xf32> to vector<8x32xf32>
    %227 = vector.extract_strided_slice %224 {offsets = [0, 32], sizes = [8, 32], strides = [1, 1]} : vector<8x128xf32> to vector<8x32xf32>
    %228 = vector.extract_strided_slice %225 {offsets = [0, 64], sizes = [8, 32], strides = [1, 1]} : vector<8x128xf32> to vector<8x32xf32>
    %229 = vector.extract_strided_slice %224 {offsets = [0, 96], sizes = [8, 32], strides = [1, 1]} : vector<8x128xf32> to vector<8x32xf32>
    %230 = arith.mulf %227, %188 : vector<8x32xf32>
    %231 = arith.mulf %226, %228 : vector<8x32xf32>
    %232 = arith.addf %230, %231 : vector<8x32xf32>
    %233 = math.tanh %232 : vector<8x32xf32>
    %234 = arith.mulf %229, %233 : vector<8x32xf32>
    %c5_i32 = arith.constant 5 : i32
    %c8_i32_71 = arith.constant 8 : i32
    %235 = arith.muli %c5_i32, %c8_i32_71 : i32
    %236 = tpu.assume_multiple %235, 8 : i32
    %237 = arith.index_cast %236 : i32 to index
    %c0_72 = arith.constant 0 : index
    %238 = vector.load %arg11[%237, %c0_72] : memref<64x128xf32, #tpu.memory_space<vmem>>, vector<8x128xf32>
    %239 = arith.truncf %219 : vector<8x32xf32> to vector<8x32xbf16>
    %c0_73 = arith.constant 0 : index
    %c0_74 = arith.constant 0 : index
    %240 = vector.load %arg3[%c0_73, %c0_74] : memref<32x128xbf16, #tpu.memory_space<vmem>>, vector<32x128xbf16>
    %cst_75 = arith.constant dense<0.000000e+00> : vector<8x128xf32>
    %241 = tpu.matmul %239, %240, %cst_75 {dimension_numbers = #tpu.dot_dimension_numbers<[1], [0], [0], [1], [0, 0, 1, 1], [], []>} : vector<8x32xbf16>, vector<32x128xbf16>, vector<8x128xf32> -> vector<8x128xf32>
    %242 = arith.addf %238, %241 : vector<8x128xf32>
    %243 = arith.index_cast %236 : i32 to index
    %c0_76 = arith.constant 0 : index
    %244 = vector.load %arg12[%243, %c0_76] : memref<64x128xf32, #tpu.memory_space<vmem>>, vector<8x128xf32>
    %245 = arith.truncf %234 : vector<8x32xf32> to vector<8x32xbf16>
    %c0_77 = arith.constant 0 : index
    %c0_78 = arith.constant 0 : index
    %246 = vector.load %arg6[%c0_77, %c0_78] : memref<32x128xbf16, #tpu.memory_space<vmem>>, vector<32x128xbf16>
    %cst_79 = arith.constant dense<0.000000e+00> : vector<8x128xf32>
    %247 = tpu.matmul %245, %246, %cst_79 {dimension_numbers = #tpu.dot_dimension_numbers<[1], [0], [0], [1], [0, 0, 1, 1], [], []>} : vector<8x32xbf16>, vector<32x128xbf16>, vector<8x128xf32> -> vector<8x128xf32>
    %248 = arith.addf %244, %247 : vector<8x128xf32>
    %249 = arith.negf %242 : vector<8x128xf32>
    %250 = math.exp %249 : vector<8x128xf32>
    %cst_80 = arith.constant 1.000000e+00 : f32
    %251 = vector.broadcast %cst_80 : f32 to vector<8x128xf32>
    %252 = arith.addf %251, %250 : vector<8x128xf32>
    %253 = arith.divf %251, %252 : vector<8x128xf32>
    %254 = math.tanh %242 : vector<8x128xf32>
    %255 = vector.extract_strided_slice %253 {offsets = [0, 0], sizes = [8, 32], strides = [1, 1]} : vector<8x128xf32> to vector<8x32xf32>
    %256 = vector.extract_strided_slice %253 {offsets = [0, 32], sizes = [8, 32], strides = [1, 1]} : vector<8x128xf32> to vector<8x32xf32>
    %257 = vector.extract_strided_slice %254 {offsets = [0, 64], sizes = [8, 32], strides = [1, 1]} : vector<8x128xf32> to vector<8x32xf32>
    %258 = vector.extract_strided_slice %253 {offsets = [0, 96], sizes = [8, 32], strides = [1, 1]} : vector<8x128xf32> to vector<8x32xf32>
    %259 = arith.mulf %256, %217 : vector<8x32xf32>
    %260 = arith.mulf %255, %257 : vector<8x32xf32>
    %261 = arith.addf %259, %260 : vector<8x32xf32>
    %262 = math.tanh %261 : vector<8x32xf32>
    %263 = arith.mulf %258, %262 : vector<8x32xf32>
    %264 = arith.negf %248 : vector<8x128xf32>
    %265 = math.exp %264 : vector<8x128xf32>
    %cst_81 = arith.constant 1.000000e+00 : f32
    %266 = vector.broadcast %cst_81 : f32 to vector<8x128xf32>
    %267 = arith.addf %266, %265 : vector<8x128xf32>
    %268 = arith.divf %266, %267 : vector<8x128xf32>
    %269 = math.tanh %248 : vector<8x128xf32>
    %270 = vector.extract_strided_slice %268 {offsets = [0, 0], sizes = [8, 32], strides = [1, 1]} : vector<8x128xf32> to vector<8x32xf32>
    %271 = vector.extract_strided_slice %268 {offsets = [0, 32], sizes = [8, 32], strides = [1, 1]} : vector<8x128xf32> to vector<8x32xf32>
    %272 = vector.extract_strided_slice %269 {offsets = [0, 64], sizes = [8, 32], strides = [1, 1]} : vector<8x128xf32> to vector<8x32xf32>
    %273 = vector.extract_strided_slice %268 {offsets = [0, 96], sizes = [8, 32], strides = [1, 1]} : vector<8x128xf32> to vector<8x32xf32>
    %274 = arith.mulf %271, %232 : vector<8x32xf32>
    %275 = arith.mulf %270, %272 : vector<8x32xf32>
    %276 = arith.addf %274, %275 : vector<8x32xf32>
    %277 = math.tanh %276 : vector<8x32xf32>
    %278 = arith.mulf %273, %277 : vector<8x32xf32>
    %c6_i32 = arith.constant 6 : i32
    %c8_i32_82 = arith.constant 8 : i32
    %279 = arith.muli %c6_i32, %c8_i32_82 : i32
    %280 = tpu.assume_multiple %279, 8 : i32
    %281 = arith.index_cast %280 : i32 to index
    %c0_83 = arith.constant 0 : index
    %282 = vector.load %arg11[%281, %c0_83] : memref<64x128xf32, #tpu.memory_space<vmem>>, vector<8x128xf32>
    %283 = arith.truncf %263 : vector<8x32xf32> to vector<8x32xbf16>
    %c0_84 = arith.constant 0 : index
    %c0_85 = arith.constant 0 : index
    %284 = vector.load %arg3[%c0_84, %c0_85] : memref<32x128xbf16, #tpu.memory_space<vmem>>, vector<32x128xbf16>
    %cst_86 = arith.constant dense<0.000000e+00> : vector<8x128xf32>
    %285 = tpu.matmul %283, %284, %cst_86 {dimension_numbers = #tpu.dot_dimension_numbers<[1], [0], [0], [1], [0, 0, 1, 1], [], []>} : vector<8x32xbf16>, vector<32x128xbf16>, vector<8x128xf32> -> vector<8x128xf32>
    %286 = arith.addf %282, %285 : vector<8x128xf32>
    %287 = arith.index_cast %280 : i32 to index
    %c0_87 = arith.constant 0 : index
    %288 = vector.load %arg12[%287, %c0_87] : memref<64x128xf32, #tpu.memory_space<vmem>>, vector<8x128xf32>
    %289 = arith.truncf %278 : vector<8x32xf32> to vector<8x32xbf16>
    %c0_88 = arith.constant 0 : index
    %c0_89 = arith.constant 0 : index
    %290 = vector.load %arg6[%c0_88, %c0_89] : memref<32x128xbf16, #tpu.memory_space<vmem>>, vector<32x128xbf16>
    %cst_90 = arith.constant dense<0.000000e+00> : vector<8x128xf32>
    %291 = tpu.matmul %289, %290, %cst_90 {dimension_numbers = #tpu.dot_dimension_numbers<[1], [0], [0], [1], [0, 0, 1, 1], [], []>} : vector<8x32xbf16>, vector<32x128xbf16>, vector<8x128xf32> -> vector<8x128xf32>
    %292 = arith.addf %288, %291 : vector<8x128xf32>
    %293 = arith.negf %286 : vector<8x128xf32>
    %294 = math.exp %293 : vector<8x128xf32>
    %cst_91 = arith.constant 1.000000e+00 : f32
    %295 = vector.broadcast %cst_91 : f32 to vector<8x128xf32>
    %296 = arith.addf %295, %294 : vector<8x128xf32>
    %297 = arith.divf %295, %296 : vector<8x128xf32>
    %298 = math.tanh %286 : vector<8x128xf32>
    %299 = vector.extract_strided_slice %297 {offsets = [0, 0], sizes = [8, 32], strides = [1, 1]} : vector<8x128xf32> to vector<8x32xf32>
    %300 = vector.extract_strided_slice %297 {offsets = [0, 32], sizes = [8, 32], strides = [1, 1]} : vector<8x128xf32> to vector<8x32xf32>
    %301 = vector.extract_strided_slice %298 {offsets = [0, 64], sizes = [8, 32], strides = [1, 1]} : vector<8x128xf32> to vector<8x32xf32>
    %302 = vector.extract_strided_slice %297 {offsets = [0, 96], sizes = [8, 32], strides = [1, 1]} : vector<8x128xf32> to vector<8x32xf32>
    %303 = arith.mulf %300, %261 : vector<8x32xf32>
    %304 = arith.mulf %299, %301 : vector<8x32xf32>
    %305 = arith.addf %303, %304 : vector<8x32xf32>
    %306 = math.tanh %305 : vector<8x32xf32>
    %307 = arith.mulf %302, %306 : vector<8x32xf32>
    %308 = arith.negf %292 : vector<8x128xf32>
    %309 = math.exp %308 : vector<8x128xf32>
    %cst_92 = arith.constant 1.000000e+00 : f32
    %310 = vector.broadcast %cst_92 : f32 to vector<8x128xf32>
    %311 = arith.addf %310, %309 : vector<8x128xf32>
    %312 = arith.divf %310, %311 : vector<8x128xf32>
    %313 = math.tanh %292 : vector<8x128xf32>
    %314 = vector.extract_strided_slice %312 {offsets = [0, 0], sizes = [8, 32], strides = [1, 1]} : vector<8x128xf32> to vector<8x32xf32>
    %315 = vector.extract_strided_slice %312 {offsets = [0, 32], sizes = [8, 32], strides = [1, 1]} : vector<8x128xf32> to vector<8x32xf32>
    %316 = vector.extract_strided_slice %313 {offsets = [0, 64], sizes = [8, 32], strides = [1, 1]} : vector<8x128xf32> to vector<8x32xf32>
    %317 = vector.extract_strided_slice %312 {offsets = [0, 96], sizes = [8, 32], strides = [1, 1]} : vector<8x128xf32> to vector<8x32xf32>
    %318 = arith.mulf %315, %276 : vector<8x32xf32>
    %319 = arith.mulf %314, %316 : vector<8x32xf32>
    %320 = arith.addf %318, %319 : vector<8x32xf32>
    %321 = math.tanh %320 : vector<8x32xf32>
    %322 = arith.mulf %317, %321 : vector<8x32xf32>
    %c7_i32 = arith.constant 7 : i32
    %c8_i32_93 = arith.constant 8 : i32
    %323 = arith.muli %c7_i32, %c8_i32_93 : i32
    %324 = tpu.assume_multiple %323, 8 : i32
    %325 = arith.index_cast %324 : i32 to index
    %c0_94 = arith.constant 0 : index
    %326 = vector.load %arg11[%325, %c0_94] : memref<64x128xf32, #tpu.memory_space<vmem>>, vector<8x128xf32>
    %327 = arith.truncf %307 : vector<8x32xf32> to vector<8x32xbf16>
    %c0_95 = arith.constant 0 : index
    %c0_96 = arith.constant 0 : index
    %328 = vector.load %arg3[%c0_95, %c0_96] : memref<32x128xbf16, #tpu.memory_space<vmem>>, vector<32x128xbf16>
    %cst_97 = arith.constant dense<0.000000e+00> : vector<8x128xf32>
    %329 = tpu.matmul %327, %328, %cst_97 {dimension_numbers = #tpu.dot_dimension_numbers<[1], [0], [0], [1], [0, 0, 1, 1], [], []>} : vector<8x32xbf16>, vector<32x128xbf16>, vector<8x128xf32> -> vector<8x128xf32>
    %330 = arith.addf %326, %329 : vector<8x128xf32>
    %331 = arith.index_cast %324 : i32 to index
    %c0_98 = arith.constant 0 : index
    %332 = vector.load %arg12[%331, %c0_98] : memref<64x128xf32, #tpu.memory_space<vmem>>, vector<8x128xf32>
    %333 = arith.truncf %322 : vector<8x32xf32> to vector<8x32xbf16>
    %c0_99 = arith.constant 0 : index
    %c0_100 = arith.constant 0 : index
    %334 = vector.load %arg6[%c0_99, %c0_100] : memref<32x128xbf16, #tpu.memory_space<vmem>>, vector<32x128xbf16>
    %cst_101 = arith.constant dense<0.000000e+00> : vector<8x128xf32>
    %335 = tpu.matmul %333, %334, %cst_101 {dimension_numbers = #tpu.dot_dimension_numbers<[1], [0], [0], [1], [0, 0, 1, 1], [], []>} : vector<8x32xbf16>, vector<32x128xbf16>, vector<8x128xf32> -> vector<8x128xf32>
    %336 = arith.addf %332, %335 : vector<8x128xf32>
    %337 = arith.negf %330 : vector<8x128xf32>
    %338 = math.exp %337 : vector<8x128xf32>
    %cst_102 = arith.constant 1.000000e+00 : f32
    %339 = vector.broadcast %cst_102 : f32 to vector<8x128xf32>
    %340 = arith.addf %339, %338 : vector<8x128xf32>
    %341 = arith.divf %339, %340 : vector<8x128xf32>
    %342 = math.tanh %330 : vector<8x128xf32>
    %343 = vector.extract_strided_slice %341 {offsets = [0, 0], sizes = [8, 32], strides = [1, 1]} : vector<8x128xf32> to vector<8x32xf32>
    %344 = vector.extract_strided_slice %341 {offsets = [0, 32], sizes = [8, 32], strides = [1, 1]} : vector<8x128xf32> to vector<8x32xf32>
    %345 = vector.extract_strided_slice %342 {offsets = [0, 64], sizes = [8, 32], strides = [1, 1]} : vector<8x128xf32> to vector<8x32xf32>
    %346 = vector.extract_strided_slice %341 {offsets = [0, 96], sizes = [8, 32], strides = [1, 1]} : vector<8x128xf32> to vector<8x32xf32>
    %347 = arith.mulf %344, %305 : vector<8x32xf32>
    %348 = arith.mulf %343, %345 : vector<8x32xf32>
    %349 = arith.addf %347, %348 : vector<8x32xf32>
    %350 = math.tanh %349 : vector<8x32xf32>
    %351 = arith.mulf %346, %350 : vector<8x32xf32>
    %352 = arith.negf %336 : vector<8x128xf32>
    %353 = math.exp %352 : vector<8x128xf32>
    %cst_103 = arith.constant 1.000000e+00 : f32
    %354 = vector.broadcast %cst_103 : f32 to vector<8x128xf32>
    %355 = arith.addf %354, %353 : vector<8x128xf32>
    %356 = arith.divf %354, %355 : vector<8x128xf32>
    %357 = math.tanh %336 : vector<8x128xf32>
    %358 = vector.extract_strided_slice %356 {offsets = [0, 0], sizes = [8, 32], strides = [1, 1]} : vector<8x128xf32> to vector<8x32xf32>
    %359 = vector.extract_strided_slice %356 {offsets = [0, 32], sizes = [8, 32], strides = [1, 1]} : vector<8x128xf32> to vector<8x32xf32>
    %360 = vector.extract_strided_slice %357 {offsets = [0, 64], sizes = [8, 32], strides = [1, 1]} : vector<8x128xf32> to vector<8x32xf32>
    %361 = vector.extract_strided_slice %356 {offsets = [0, 96], sizes = [8, 32], strides = [1, 1]} : vector<8x128xf32> to vector<8x32xf32>
    %362 = arith.mulf %359, %320 : vector<8x32xf32>
    %363 = arith.mulf %358, %360 : vector<8x32xf32>
    %364 = arith.addf %362, %363 : vector<8x32xf32>
    %365 = math.tanh %364 : vector<8x32xf32>
    %366 = arith.mulf %361, %365 : vector<8x32xf32>
    %c8_i32_104 = arith.constant 8 : i32
    %367 = arith.truncf %351 : vector<8x32xf32> to vector<8x32xbf16>
    %c0_105 = arith.constant 0 : index
    %c0_106 = arith.constant 0 : index
    %368 = vector.load %arg8[%c0_105, %c0_106] : memref<64x128xbf16, #tpu.memory_space<vmem>>, vector<32x128xbf16>
    %cst_107 = arith.constant dense<0.000000e+00> : vector<8x128xf32>
    %369 = tpu.matmul %367, %368, %cst_107 {dimension_numbers = #tpu.dot_dimension_numbers<[1], [0], [0], [1], [0, 0, 1, 1], [], []>} : vector<8x32xbf16>, vector<32x128xbf16>, vector<8x128xf32> -> vector<8x128xf32>
    %370 = arith.truncf %366 : vector<8x32xf32> to vector<8x32xbf16>
    %c32 = arith.constant 32 : index
    %c0_108 = arith.constant 0 : index
    %371 = vector.load %arg8[%c32, %c0_108] : memref<64x128xbf16, #tpu.memory_space<vmem>>, vector<32x128xbf16>
    %cst_109 = arith.constant dense<0.000000e+00> : vector<8x128xf32>
    %372 = tpu.matmul %370, %371, %cst_109 {dimension_numbers = #tpu.dot_dimension_numbers<[1], [0], [0], [1], [0, 0, 1, 1], [], []>} : vector<8x32xbf16>, vector<32x128xbf16>, vector<8x128xf32> -> vector<8x128xf32>
    %373 = arith.addf %369, %372 : vector<8x128xf32>
    %c0_110 = arith.constant 0 : index
    %c0_111 = arith.constant 0 : index
    %374 = vector.load %arg9[%c0_110, %c0_111] : memref<1x128xf32, #tpu.memory_space<vmem>>, vector<1x128xf32>
    %375 = vector.broadcast %374 : vector<1x128xf32> to vector<8x128xf32>
    %376 = arith.addf %373, %375 : vector<8x128xf32>
    %c0_112 = arith.constant 0 : index
    %c0_113 = arith.constant 0 : index
    %377 = vector.load %arg10[%c0_112, %c0_113] : memref<8x128xf32, #tpu.memory_space<vmem>>, vector<8x128xf32>
    tpu.vector_store %arg10[%c0_112, %c0_113], %376 {strides = array<i32>} : memref<8x128xf32, #tpu.memory_space<vmem>>, vector<8x128xf32>,
    return
  }
}

</mosaic_0001>

<bundles_post_ra>
// kernel: td_lstm_forward.1
= control target key start
LH: loop header
LB: loop body
LE: loop exit
PB: predicated region body
PF: predicated region fallthrough
CT: control target
= control target key end

     0   :  { %vm130_vm0 = vcmask 1043456   ;;  %vm105_vm1 = vcmask 359424   ;;  %vm2694_vm2 = vmmov 1   ;;  %vm2696_vm4 = vmmov 0   ;;  %s2699_s19 = smov 32   ;;  %s3494_s2 = inlined_call_operand.vmem [shape: f32[300,128], index: 2, kind: input, shape index: {}]   ;;  %s3495_s0 = inlined_call_operand.vmem [shape: f32[64,300], index: 0, kind: input, shape index: {}]   ;;  %s3496_s5 = inlined_call_operand.vmem [shape: f32[300,128], index: 5, kind: input, shape index: {}]   ;;  %s3497_s1 = inlined_call_operand.vmem [shape: f32[64,300], index: 1, kind: input, shape index: {}]   ;;  %s3498_s3 = inlined_call_operand.vmem [shape: bf16[32,128], index: 3, kind: input, shape index: {}]   ;;  %s3499_s6 = inlined_call_operand.vmem [shape: bf16[32,128], index: 6, kind: input, shape index: {}]   ;;  %s3500_s4 = inlined_call_operand.vmem [shape: f32[1,128], index: 4, kind: input, shape index: {}]   ;;  %s3501_s7 = inlined_call_operand.vmem [shape: f32[1,128], index: 7, kind: input, shape index: {}]   ;;  %s3502_s8 = inlined_call_operand.vmem [shape: bf16[64,128], index: 8, kind: input, shape index: {}]   ;;  %s3503_s9 = inlined_call_operand.vmem [shape: f32[1,128], index: 9, kind: input, shape index: {}]   ;;  %s3504_s10 = inlined_call_operand.vmem [shape: f32[8,128], index: 10, kind: output, shape index: {}]  }
   0x1   :  { %v76_v0 = vld [vmem:[%s3494_s2 + $0x80] sm:$0xff]  ;;  %v77_v1 = vld [vmem:[%s3494_s2 + $0x88] sm:$0xff]  ;;  %v78_v9 = vld [vmem:[%s3494_s2 + $0x90] sm:$0xff]  ;;  %vm683_vm5 = vcmask 261120  }
   0x2   :  { %v92_v2 = vld [vmem:[%s3494_s2 + $0x100] sm:$0xff]  ;;  %v2456_v3 = vpack.c.bf16 %v77_v1, %v76_v0  ;;  %v93_v4 = vld [vmem:[%s3494_s2 + $0x108] sm:$0xff]  ;;  %v79_v10 = vld [vmem:[%s3494_s2 + $0x98] sm:$0xff] }
   0x3   :  { %v60_v5 = vld [vmem:[%s3494_s2] sm:$0xff]  ;;  %v61_v6 = vld [vmem:[%s3494_s2 + $0x8] sm:$0xff]  ;;  %v2488_v7 = vpack.c.bf16 %v93_v4, %v92_v2  ;;  %v94_v11 = vld [vmem:[%s3494_s2 + $0x110] sm:$0xff]  ;;  %v2460_v12 = vpack.c.bf16 %v79_v10, %v78_v9 }
   0x4   :  { %v2458_v8 = vpack.c.bf16 %v61_v6, %v60_v5  ;;  %2457 = vmatprep.subr.bf16.mxu0 %v2456_v3  ;;  %v95_v13 = vld [vmem:[%s3494_s2 + $0x118] sm:$0xff]  ;;  %v62_v14 = vld [vmem:[%s3494_s2 + $0x10] sm:$0xff]  ;;  %v80_v18 = vld [vmem:[%s3494_s2 + $0xa0] sm:$0xff] }
   0x5   :  { %v63_v15 = vld [vmem:[%s3494_s2 + $0x18] sm:$0xff]  ;;  %2489 = vmatprep.subr.bf16.mxu1 %v2488_v7  ;;  %v2492_v16 = vpack.c.bf16 %v95_v13, %v94_v11  ;;  %v81_v19 = vld [vmem:[%s3494_s2 + $0xa8] sm:$0xff]  ;;  %v96_v20 = vld [vmem:[%s3494_s2 + $0x120] sm:$0xff] }
   0x6   :  { %2459 = vmatpush3.bf16.msra.mxu0 %v2458_v8  ;;  %v2462_v17 = vpack.c.bf16 %v63_v15, %v62_v14  ;;  %2491 = vmatpush3.bf16.msra.mxu1 %v2488_v7  ;;  %v2464_v21 = vpack.c.bf16 %v81_v19, %v80_v18  ;;  %v97_v22 = vld [vmem:[%s3494_s2 + $0x128] sm:$0xf]  ;;  %v64_v23 = vld [vmem:[%s3494_s2 + $0x20] sm:$0xff]  ;;  %v38_v26 = vld [vmem:[%s3495_s0 + $0x10] sm:$0xff] }
   0x7   :  { %2461 = vmatprep.subr.bf16.mxu0 %v2460_v12  ;;  %2493 = vmatprep.subr.bf16.mxu1 %v2492_v16  ;;  %v2496_v24 = vpack.c.bf16 %v97_v22, %v96_v20  ;;  %v65_v25 = vld [vmem:[%s3494_s2 + $0x28] sm:$0xff]  ;;  %v82_v27 = vld [vmem:[%s3494_s2 + $0xb0] sm:$0xff]  ;;  %vm2816_vm3 = vmpackc.low %vm130_vm0, %vm2694_vm2 }
   0x8   :  { %2276 = vmatprep.mubr.msk.f32.mxu1 %vm105_vm1, %v38_v26  ;;  %v83_v29 = vld [vmem:[%s3494_s2 + $0xb8] sm:$0xff]  ;;  %v392_v30 = vld [vmem:[%s3496_s5 + $0x80] sm:$0xff]  ;;  %v2466_v31 = vpack.c.bf16 %v65_v25, %v64_v23  ;;  %v393_v32 = vld [vmem:[%s3496_s5 + $0x88] sm:$0xff] }
   0x9   :  { %v2468_v33 = vpack.c.bf16 %v83_v29, %v82_v27  ;;  %v66_v34 = vld [vmem:[%s3494_s2 + $0x30] sm:$0xff]  ;;  %v67_v35 = vld [vmem:[%s3494_s2 + $0x38] sm:$0xff]  ;;  %v376_v36 = vld [vmem:[%s3496_s5] sm:$0xff]  ;;  %v2502_v37 = vpack.c.bf16 %v393_v32, %v392_v30 }
   0xa   :  { %2463 = vmatpush3.bf16.msra.mxu0 %v2462_v17  ;;  %2495 = vmatpush3.bf16.msra.mxu1 %v2492_v16  ;;  %v377_v38 = vld [vmem:[%s3496_s5 + $0x8] sm:$0xff]  ;;  %v84_v39 = vld [vmem:[%s3494_s2 + $0xc0] sm:$0xff]  ;;  %v394_v41 = vld [vmem:[%s3496_s5 + $0x90] sm:$0xff]  ;;  %v2470_v44 = vpack.c.bf16 %v67_v35, %v66_v34 }
   0xb   :  { %2465 = vmatprep.subr.bf16.mxu0 %v2464_v21  ;;  %2498 = vmatprep.subr.msk.bf16.mxu1 %vm2816_vm3, %v2496_v24  ;;  %v85_v40 = vld [vmem:[%s3494_s2 + $0xc8] sm:$0xff]  ;;  %v395_v42 = vld [vmem:[%s3496_s5 + $0x98] sm:$0xff]  ;;  %v2504_v45 = vpack.c.bf16 %v377_v38, %v376_v36  ;;  %v68_v47 = vld [vmem:[%s3494_s2 + $0x40] sm:$0xff] }
   0xc   :  { %v41_v43 = vld [vmem:[%s3495_s0 + $0x28] sm:$0xff]  ;;  %v2472_v46 = vpack.c.bf16 %v85_v40, %v84_v39  ;;  %v378_v49 = vld [vmem:[%s3496_s5 + $0x10] sm:$0xff]  ;;  %v2506_v50 = vpack.c.bf16 %v395_v42, %v394_v41  ;;  %v379_v51 = vld [vmem:[%s3496_s5 + $0x18] sm:$0xff] }
   0xd   :  { %v69_v48 = vld [vmem:[%s3494_s2 + $0x48] sm:$0xff]  ;;  %v86_v52 = vld [vmem:[%s3494_s2 + $0xd0] sm:$0xff]  ;;  %v87_v53 = vld [vmem:[%s3494_s2 + $0xd8] sm:$0xff]  ;;  %v2508_v57 = vpack.c.bf16 %v379_v51, %v378_v49 }
   0xe   :  { %2467 = vmatpush3.bf16.msra.mxu0 %v2466_v31  ;;  %2501 = vmatpush3.bf16.msk.msra.mxu1 %vm2816_vm3, %v2496_v24  ;;  %v396_v54 = vld [vmem:[%s3496_s5 + $0xa0] sm:$0xff]  ;;  %v397_v55 = vld [vmem:[%s3496_s5 + $0xa8] sm:$0xff]  ;;  %v2474_v56 = vpack.c.bf16 %v69_v48, %v68_v47  ;;  %v2476_v58 = vpack.c.bf16 %v87_v53, %v86_v52  ;;  %v70_v59 = vld [vmem:[%s3494_s2 + $0x50] sm:$0xff] }
   0xf   :  { %2469 = vmatprep.subr.bf16.mxu0 %v2468_v33  ;;  %2503 = vmatprep.subr.bf16.mxu1 %v2502_v37  ;;  %v71_v60 = vld [vmem:[%s3494_s2 + $0x58] sm:$0xff]  ;;  %v380_v61 = vld [vmem:[%s3496_s5 + $0x20] sm:$0xff]  ;;  %v2510_v62 = vpack.c.bf16 %v397_v55, %v396_v54  ;;  %v381_v63 = vld [vmem:[%s3496_s5 + $0x28] sm:$0xff] }
  0x10   :  { %v88_v0 = vld [vmem:[%s3494_s2 + $0xe0] sm:$0xff]  ;;  %v89_v1 = vld [vmem:[%s3494_s2 + $0xe8] sm:$0xff]  ;;  %v398_v2 = vld [vmem:[%s3496_s5 + $0xb0] sm:$0xff]  ;;  %v2478_v4 = vpack.c.bf16 %v71_v60, %v70_v59  ;;  %v2512_v8 = vpack.c.bf16 %v381_v63, %v380_v61 }
  0x11   :  { %2277 = vmatmul.mubr.msk.f32.vlgmr.msra.gmra.mrb[0].mxu1 %vm105_vm1, %v41_v43  ;;  %v399_v3 = vld [vmem:[%s3496_s5 + $0xb8] sm:$0xff]  ;;  %v72_v5 = vld [vmem:[%s3494_s2 + $0x60] sm:$0xff]  ;;  %v37_v6 = vld [vmem:[%s3495_s0 + $0x8] sm:$0xff]  ;;  %v2480_v9 = vpack.c.bf16 %v89_v1, %v88_v0 }
  0x12   :  { %2471 = vmatpush3.bf16.msra.mxu0 %v2470_v44  ;;  %2505 = vmatpush3.bf16.msra.mxu1 %v2504_v45  ;;  %v44_v7 = vld [vmem:[%s3495_s0 + $0x40] sm:$0xff]  ;;  %v73_v10 = vld [vmem:[%s3494_s2 + $0x68] sm:$0xff]  ;;  %v382_v11 = vld [vmem:[%s3496_s5 + $0x30] sm:$0xff]  ;;  %v2514_v13 = vpack.c.bf16 %v399_v3, %v398_v2 }
  0x13   :  { %2473 = vmatprep.subr.bf16.mxu0 %v2472_v46  ;;  %2507 = vmatprep.subr.bf16.mxu1 %v2506_v50  ;;  %v47_v12 = vld [vmem:[%s3495_s0 + $0x58] sm:$0xff]  ;;  %v90_v15 = vld [vmem:[%s3494_s2 + $0xf0] sm:$0xff]  ;;  %v400_v17 = vld [vmem:[%s3496_s5 + $0xc0] sm:$0xff]  ;;  %v2482_v19 = vpack.c.bf16 %v73_v10, %v72_v5 }
  0x14   :  { %v383_v14 = vld [vmem:[%s3496_s5 + $0x38] sm:$0xff]  ;;  %198 = vmatprep.mubr.f32.mxu0 %v37_v6  ;;  %v401_v18 = vld [vmem:[%s3496_s5 + $0xc8] sm:$0xff]  ;;  %2279 = vmatprep.mubr.msk.f32.mxu1 %vm105_vm1, %v44_v7  ;;  %v74_v20 = vld [vmem:[%s3494_s2 + $0x70] sm:$0xff] }
  0x15   :  { %v91_v16 = vld [vmem:[%s3494_s2 + $0xf8] sm:$0xff]  ;;  %2280 = vmatmul.mubr.msk.f32.gmra.mrb[2].mxu1 %vm105_vm1, %v47_v12  ;;  %v50_v21 = vld [vmem:[%s3495_s0 + $0x70] sm:$0xff]  ;;  %v2516_v22 = vpack.c.bf16 %v383_v14, %v382_v11  ;;  %v384_v25 = vld [vmem:[%s3496_s5 + $0x40] sm:$0xff]  ;;  %v2518_v27 = vpack.c.bf16 %v401_v18, %v400_v17 }
  0x16   :  { %2475 = vmatpush3.bf16.msra.mxu0 %v2474_v56  ;;  %2509 = vmatpush3.bf16.msra.mxu1 %v2508_v57  ;;  %v2484_v23 = vpack.c.bf16 %v91_v16, %v90_v15  ;;  %v75_v24 = vld [vmem:[%s3494_s2 + $0x78] sm:$0xff]  ;;  %v53_v26 = vld [vmem:[%s3495_s0 + $0x88] sm:$0xff]  ;;  %v408_v30 = vld [vmem:[%s3496_s5 + $0x100] sm:$0xff] }
  0x17   :  { %2477 = vmatprep.subr.bf16.mxu0 %v2476_v58  ;;  %2511 = vmatprep.subr.bf16.mxu1 %v2510_v62  ;;  %v385_v29 = vld [vmem:[%s3496_s5 + $0x48] sm:$0xff]  ;;  %v402_v32 = vld [vmem:[%s3496_s5 + $0xd0] sm:$0xff]  ;;  %v403_v33 = vld [vmem:[%s3496_s5 + $0xd8] sm:$0xff]  ;;  %v2486_v35 = vpack.c.bf16 %v75_v24, %v74_v20 }
  0x18   :  { %v409_v31 = vld [vmem:[%s3496_s5 + $0x108] sm:$0xff]  ;;  %2282 = vmatprep.mubr.msk.f32.mxu1 %vm105_vm1, %v50_v21  ;;  %v56_v34 = vld [vmem:[%s3495_s0 + $0xa0] sm:$0xff]  ;;  %v386_v36 = vld [vmem:[%s3496_s5 + $0x50] sm:$0xff]  ;;  %v2520_v37 = vpack.c.bf16 %v385_v29, %v384_v25  ;;  %v2522_v42 = vpack.c.bf16 %v403_v33, %v402_v32 }
  0x19   :  { %2283 = vmatmul.mubr.msk.f32.gmra.mrb[4].mxu1 %vm105_vm1, %v53_v26  ;;  %v2534_v38 = vpack.c.bf16 %v409_v31, %v408_v30  ;;  %v387_v39 = vld [vmem:[%s3496_s5 + $0x58] sm:$0xff]  ;;  %v404_v40 = vld [vmem:[%s3496_s5 + $0xe0] sm:$0xff]  ;;  %v405_v43 = vld [vmem:[%s3496_s5 + $0xe8] sm:$0xff] }
  0x1a   :  { %2479 = vmatpush3.bf16.msra.mxu0 %v2478_v4  ;;  %2513 = vmatpush3.bf16.msra.mxu1 %v2512_v8  ;;  %v59_v41 = vld [vmem:[%s3495_s0 + $0xb8] sm:$0xff]  ;;  %v410_v44 = vld [vmem:[%s3496_s5 + $0x110] sm:$0xff]  ;;  %v353_v46 = vld [vmem:[%s3497_s1 + $0x8] sm:$0xff]  ;;  %v2524_v48 = vpack.c.bf16 %v387_v39, %v386_v36  ;;  %v2526_v51 = vpack.c.bf16 %v405_v43, %v404_v40  ;;  %v2695_v8 = vmov 0.0  }
  0x1b   :  { %2481 = vmatprep.subr.bf16.mxu0 %v2480_v9  ;;  %2515 = vmatprep.subr.bf16.mxu1 %v2514_v13  ;;  %v411_v45 = vld [vmem:[%s3496_s5 + $0x118] sm:$0xff]  ;;  %v36_v47 = vld [vmem:[%s3495_s0] sm:$0xff]  ;;  %v389_v53 = vld [vmem:[%s3496_s5 + $0x68] sm:$0xff] }
  0x1c   :  { %2285 = vmatprep.mubr.msk.f32.mxu1 %vm105_vm1, %v56_v34  ;;  %v40_v49 = vld [vmem:[%s3495_s0 + $0x20] sm:$0xff]  ;;  %v2538_v50 = vpack.c.bf16 %v411_v45, %v410_v44  ;;  %v406_v55 = vld [vmem:[%s3496_s5 + $0xf0] sm:$0xff]  ;;  %v407_v56 = vld [vmem:[%s3496_s5 + $0xf8] sm:$0xff] }
  0x1d   :  { %2286 = vmatmul.mubr.msk.f32.gmra.mrb[6].mxu1 %vm105_vm1, %v59_v41  ;;  %v388_v52 = vld [vmem:[%s3496_s5 + $0x60] sm:$0xff]  ;;  %v413_v57 = vld [vmem:[%s3496_s5 + $0x128] sm:$0xf]  ;;  %v39_v58 = vld [vmem:[%s3495_s0 + $0x18] sm:$0xff]  ;;  %v2530_v63 = vpack.c.bf16 %v407_v56, %v406_v55  ;;  %v2697_v41 = vmov 0  }
  0x1e   :  { %2483 = vmatpush3.bf16.msra.mxu0 %v2482_v19  ;;  %2517 = vmatpush3.bf16.msra.mxu1 %v2516_v22  ;;  %v412_v54 = vld [vmem:[%s3496_s5 + $0x120] sm:$0xff]  ;;  %v2528_v59 = vpack.c.bf16 %v389_v53, %v388_v52  ;;  %v43_v60 = vld [vmem:[%s3495_s0 + $0x38] sm:$0xff]  ;;  %v390_v61 = vld [vmem:[%s3496_s5 + $0x70] sm:$0xff] }
  0x1f   :  { %2485 = vmatprep.subr.bf16.mxu0 %v2484_v23  ;;  %2519 = vmatprep.subr.bf16.mxu1 %v2518_v27  ;;  %v2542_v62 = vpack.c.bf16 %v413_v57, %v412_v54  ;;  %v391_v0 = vld [vmem:[%s3496_s5 + $0x78] sm:$0xff]  ;;  %v42_v1 = vld [vmem:[%s3495_s0 + $0x30] sm:$0xff]  ;;  %v45_v4 = vld [vmem:[%s3495_s0 + $0x48] sm:$0xff] }
  0x20   :  { %512 = vmatprep.mubr.f32.mxu1 %v353_v46  ;;  %v2532_v2 = vpack.c.bf16 %v391_v0, %v390_v61  ;;  %v46_v3 = vld [vmem:[%s3495_s0 + $0x50] sm:$0xff]  ;;  %v352_v5 = vld [vmem:[%s3497_s1] sm:$0xff]  ;;  %v49_v7 = vld [vmem:[%s3495_s0 + $0x68] sm:$0xff] }
  0x21   :  { %v3061_v6 = vld [vmem:[%s3498_s3] sm:$0xff]   ;;  %v355_v10 = vld [vmem:[%s3497_s1 + $0x18] sm:$0xff]  ;;  %v3084_v12 = vld [vmem:[%s3498_s3 + $0x8] sm:$0xff]  }
  0x22   :  { %2487 = vmatpush3.bf16.msra.mxu0 %v2486_v35  ;;  %2521 = vmatpush3.bf16.msra.mxu1 %v2520_v37  ;;  %v356_v28 = vld [vmem:[%s3497_s1 + $0x20] sm:$0xff]  ;;  %v359_v13 = vld [vmem:[%s3497_s1 + $0x38] sm:$0xff]  ;;  %v358_v15 = vld [vmem:[%s3497_s1 + $0x30] sm:$0xff] }
  0x23   :  { %2535 = vmatprep.subr.bf16.mxu0 %v2534_v38  ;;  %2523 = vmatprep.subr.bf16.mxu1 %v2522_v42  ;;  %v48_v9 = vld [vmem:[%s3495_s0 + $0x60] sm:$0xff]  ;;  %v51_v14 = vld [vmem:[%s3495_s0 + $0x78] sm:$0xff]  ;;  %v362_v17 = vld [vmem:[%s3497_s1 + $0x50] sm:$0xff] }
  0x24   :  { %v52_v11 = vld [vmem:[%s3495_s0 + $0x80] sm:$0xff]  ;;  %v55_v16 = vld [vmem:[%s3495_s0 + $0x98] sm:$0xff]  ;;  %v54_v18 = vld [vmem:[%s3495_s0 + $0x90] sm:$0xff] }
  0x25   :  { %199 = vmatmul.mubr.f32.vlgmr.msra.gmra.mrb[0].mxu0 %v36_v47  ;;  %v361_v19 = vld [vmem:[%s3497_s1 + $0x48] sm:$0xff]  ;;  %v58_v20 = vld [vmem:[%s3495_s0 + $0xb0] sm:$0xff]  ;;  %v364_v23 = vld [vmem:[%s3497_s1 + $0x60] sm:$0xff] }
  0x26   :  { %2537 = vmatpush3.bf16.msra.mxu0 %v2534_v38  ;;  %203 = vmatprep.mubr.f32.mxu0 %v40_v49  ;;  %v365_v21 = vld [vmem:[%s3497_s1 + $0x68] sm:$0xff]  ;;  %v354_v24 = vld [vmem:[%s3497_s1 + $0x10] sm:$0xff]  ;;  %v368_v25 = vld [vmem:[%s3497_s1 + $0x80] sm:$0xff] }
  0x27   :  { %2525 = vmatpush3.bf16.msra.mxu1 %v2524_v48  ;;  %2539 = vmatprep.subr.bf16.mxu0 %v2538_v50  ;;  %v57_v22 = vld [vmem:[%s3495_s0 + $0xa8] sm:$0xff]  ;;  %v3135_v27 = vld [vmem:[%s3499_s6] sm:$0xff]   ;;  %v367_v29 = vld [vmem:[%s3497_s1 + $0x78] sm:$0xff] }
  0x28   :  { %2527 = vmatprep.subr.bf16.mxu1 %v2526_v51  ;;  %v357_v26 = vld [vmem:[%s3497_s1 + $0x28] sm:$0xff]  ;;  %v371_v30 = vld [vmem:[%s3497_s1 + $0x98] sm:$0xff]  ;;  %v360_v31 = vld [vmem:[%s3497_s1 + $0x40] sm:$0xff] }
  0x29   :  { %204 = vmatmul.mubr.f32.gmra.mrb[2].mxu0 %v39_v58  ;;  %v363_v32 = vld [vmem:[%s3497_s1 + $0x58] sm:$0xff]  ;;  %v370_v33 = vld [vmem:[%s3497_s1 + $0x90] sm:$0xff]  ;;  %v3161_v35 = vld [vmem:[%s3499_s6 + $0x8] sm:$0xff]  }
  0x2a   :  { %208 = vmatprep.mubr.f32.mxu0 %v43_v60  ;;  %2541 = vmatpush3.bf16.msra.mxu0 %v2538_v50  ;;  %v366_v34 = vld [vmem:[%s3497_s1 + $0x70] sm:$0xff]  ;;  %v369_v37 = vld [vmem:[%s3497_s1 + $0x88] sm:$0xff]  ;;  %v372_v39 = vld [vmem:[%s3497_s1 + $0xa0] sm:$0xff] }
  0x2b   :  { %2529 = vmatpush3.bf16.msra.mxu1 %v2528_v59  ;;  %2544 = vmatprep.subr.msk.bf16.mxu0 %vm2816_vm3, %v2542_v62  ;;  %v374_v36 = vld [vmem:[%s3497_s1 + $0xb0] sm:$0xff]  ;;  %v373_v38 = vld [vmem:[%s3497_s1 + $0xa8] sm:$0xff]  ;;  %v375_v40 = vld [vmem:[%s3497_s1 + $0xb8] sm:$0xff] }
  0x2c   :  { %2531 = vmatprep.subr.bf16.mxu1 %v2530_v63  ;;  %v2009_v51 = vld [vmem:[%s3500_s4] ss:$0 sm:$0xff] }
  0x2d   :  { %209 = vmatmul.mubr.f32.gmra.mrb[4].mxu0 %v42_v1 }
  0x2e   :  { %213 = vmatprep.mubr.f32.mxu0 %v46_v3  ;;  %2547 = vmatpush3.bf16.msk.msra.mxu0 %vm2816_vm3, %v2542_v62 }
  0x2f   :  { %2533 = vmatpush3.bf16.msra.mxu1 %v2532_v2  ;;  %2320 = vmatprep.subr.bf16.mxu0 %v2695_v8 }
  0x30   :  { %2312 = vmatprep.subr.bf16.mxu1 %v2695_v8 }
  0x31   :  { %214 = vmatmul.mubr.f32.gmra.mrb[6].mxu0 %v45_v4 }
  0x32   :  { %513 = vmatmul.mubr.f32.vlgmr.msra.gmra.mrb[8].mxu1 %v352_v5  ;;  %218 = vmatprep.mubr.f32.mxu0 %v49_v7 }
  0x33   :  { %2313 = vmatpush3.bf16.msra.mxu1 %v3061_v6  ;;  %517 = vmatprep.mubr.f32.mxu1 %v356_v28 }
  0x34   :  { %2314 = vmatprep.subr.bf16.mxu1 %v2695_v8 }
  0x35   :  { %219 = vmatmul.mubr.f32.gmra.mrb[8].mxu0 %v48_v9 }
  0x36   :  { %518 = vmatmul.mubr.f32.gmra.mrb[10].mxu1 %v355_v10  ;;  %223 = vmatprep.mubr.f32.mxu0 %v52_v11 }
  0x37   :  { %522 = vmatprep.mubr.f32.mxu1 %v359_v13  ;;  %2315 = vmatpush3.bf16.msra.mxu1 %v3084_v12 }
  0x38   :  { %2328 = vmatprep.subr.bf16.mxu1 %v2695_v8 }
  0x39   :  { %224 = vmatmul.mubr.f32.gmra.mrb[10].mxu0 %v51_v14 }
  0x3a   :  { %523 = vmatmul.mubr.f32.gmra.mrb[12].mxu1 %v358_v15  ;;  %228 = vmatprep.mubr.f32.mxu0 %v55_v16 }
  0x3b   :  { %527 = vmatprep.mubr.f32.mxu1 %v362_v17 }
  0x3d   :  { %229 = vmatmul.mubr.f32.gmra.mrb[12].mxu0 %v54_v18 }
  0x3e   :  { %528 = vmatmul.mubr.f32.gmra.mrb[14].mxu1 %v361_v19  ;;  %233 = vmatprep.mubr.f32.mxu0 %v58_v20  ;;  %v2019_v20 = vld [vmem:[%s3501_s7] ss:$0 sm:$0xff]  ;;  %s2698_s7 = smov 64  }
  0x3f   :  { %532 = vmatprep.mubr.f32.mxu1 %v365_v21 }
  0x41   :  { %234 = vmatmul.mubr.f32.gmra.mrb[14].mxu0 %v57_v22 }
  0x42   :  { %533 = vmatmul.mubr.f32.gmra.mrb[16].mxu1 %v364_v23  ;;  %2300 = vmatprep.mubr.msk.f32.mxu0 %vm105_vm1, %v354_v24 }
  0x43   :  { %537 = vmatprep.mubr.f32.mxu1 %v368_v25 }
  0x45   :  { %2301 = vmatmul.mubr.msk.f32.vlgmr.msra.gmra.mrb[16].mxu0 %vm105_vm1, %v357_v26 }
  0x46   :  { %538 = vmatmul.mubr.f32.gmra.mrb[18].mxu1 %v367_v29  ;;  %2321 = vmatpush3.bf16.msra.mxu0 %v3135_v27 }
  0x47   :  { %542 = vmatprep.mubr.f32.mxu1 %v371_v30  ;;  %2303 = vmatprep.mubr.msk.f32.mxu0 %vm105_vm1, %v360_v31 }
  0x48   :  { %2322 = vmatprep.subr.bf16.mxu0 %v2695_v8 }
  0x49   :  { %2304 = vmatmul.mubr.msk.f32.gmra.mrb[18].mxu0 %vm105_vm1, %v363_v32 }
  0x4a   :  { %543 = vmatmul.mubr.f32.gmra.mrb[20].mxu1 %v370_v33  ;;  %2306 = vmatprep.mubr.msk.f32.mxu0 %vm105_vm1, %v366_v34 }
  0x4b   :  { %547 = vmatprep.mubr.f32.mxu1 %v374_v36  ;;  %2323 = vmatpush3.bf16.msra.mxu0 %v3161_v35 }
  0x4c   :  { %2336 = vmatprep.subr.bf16.mxu0 %v2695_v8 }
  0x4d   :  { %2307 = vmatmul.mubr.msk.f32.gmra.mrb[20].mxu0 %vm105_vm1, %v369_v37 }
  0x4e   :  { %548 = vmatmul.mubr.f32.gmra.mrb[22].mxu1 %v373_v38  ;;  %2309 = vmatprep.mubr.msk.f32.mxu0 %vm105_vm1, %v372_v39 }
  0x4f   :  { %2316 = vmatprep.mubr.msk.bf16.mxu1 %vm2696_vm4, %v2695_v8 }
  0x51   :  { %2310 = vmatmul.mubr.msk.f32.gmra.mrb[22].mxu0 %vm105_vm1, %v375_v40 }
  0x52   :  { %2317 = vmatmul.mubr.bf16.vlgmr.msra.gmra.mrb[24].mxu1 %v2697_v41  ;;  %2324 = vmatprep.mubr.msk.bf16.mxu0 %vm2696_vm4, %v2695_v8 }
  0x53   :  { %2329 = vmatpush3.bf16.msra.mxu1 %v3061_v6  ;;  %2332 = vmatprep.mubr.msk.bf16.mxu1 %vm2696_vm4, %v2695_v8 }
  0x54   :  { %2330 = vmatprep.subr.bf16.mxu1 %v2695_v8 }
  0x55   :  { %2325 = vmatmul.mubr.bf16.vlgmr.msra.gmra.mrb[24].mxu0 %v2697_v41 }
  0x56   :  { %2337 = vmatpush3.bf16.msra.mxu0 %v3135_v27  ;;  %2340 = vmatprep.mubr.msk.bf16.mxu0 %vm2696_vm4, %v2695_v8 }
  0x57   :  { %2331 = vmatpush3.bf16.msra.mxu1 %v3084_v12  ;;  %2338 = vmatprep.subr.bf16.mxu0 %v2695_v8 }
  0x58   :  { %2344 = vmatprep.subr.bf16.mxu1 %v2695_v8 }
  0x5a   :  { %2339 = vmatpush3.bf16.msra.mxu0 %v3161_v35 }
  0x5b   :  { %2352 = vmatprep.subr.bf16.mxu0 %v2695_v8 }
  0xe4   :  { %v2278_v42 = vpop.f32.mrb[0].mxu1 }
  0xe5   :  { %v305_v43 = vpop.f32.mrb[1].mxu1 }
  0xe8   :  { %v2281_v44 = vpop.f32.mrb[2].mxu1 }
  0xe9   :  { %v315_v45 = vpop.f32.mrb[3].mxu1 }
  0xec   :  { %v2284_v46 = vpop.f32.mrb[4].mxu1 }
  0xed   :  { %v325_v47 = vpop.f32.mrb[5].mxu1 }
  0xf0   :  { %v3202_v48 = vpop.f32.mrb[6].mxu1 }
  0xf1   :  { %v335_v49 = vpop.f32.mrb[7].mxu1 }
  0xf8   :  { %v2102_v50 = vpop.f32.mrb[0].mxu0 }
  0xf9   :  { %v2103_v52 = vpop.f32.mrb[1].mxu0 }
  0xfa   :  { %v2104_v53 = vadd.f32 %v2103_v52, %v2102_v50 }
  0xfc   :  { %v201_v54 = vadd.f32 %v2104_v53, %v2009_v51  ;;  %v2105_v55 = vpop.f32.mrb[2].mxu0 }
  0xfd   :  { %v2106_v56 = vpop.f32.mrb[3].mxu0 }
  0xfe   :  { %v2107_v57 = vadd.f32 %v2106_v56, %v2105_v55  ;;  %v3207_v58 = vadd.f32 %v305_v43, %v201_v54 }
 0x100   :  { %v206_v59 = vadd.f32 %v2107_v57, %v2009_v51  ;;  %v2108_v60 = vpop.f32.mrb[4].mxu0 }
 0x101   :  { %v2109_v61 = vpop.f32.mrb[5].mxu0 }
 0x102   :  { %v2110_v62 = vadd.f32 %v2109_v61, %v2108_v60  ;;  %v3209_v63 = vadd.f32 %v2278_v42, %v206_v59 }
 0x104   :  { %v211_v0 = vadd.f32 %v2110_v62, %v2009_v51  ;;  %v2111_v1 = vpop.f32.mrb[6].mxu0 }
 0x105   :  { %v2172_v2 = vpop.f32.mrb[8].mxu1  ;;  %v2112_v3 = vpop.f32.mrb[7].mxu0 }
 0x106   :  { %v2113_v4 = vadd.f32 %v2112_v3, %v2111_v1  ;;  %v2173_v5 = vpop.f32.mrb[9].mxu1  ;;  %v3211_v7 = vadd.f32 %v315_v45, %v211_v0 }
 0x107   :  { %v2174_v28 = vadd.f32 %v2173_v5, %v2172_v2 }
 0x108   :  { %v216_v9 = vadd.f32 %v2113_v4, %v2009_v51  ;;  %v2114_v10 = vpop.f32.mrb[8].mxu0 }
 0x109   :  { %v2175_v11 = vpop.f32.mrb[10].mxu1  ;;  %v2115_v13 = vpop.f32.mrb[9].mxu0  ;;  %v515_v55 = vadd.f32 %v2174_v28, %v2019_v20 }
 0x10a   :  { %v2116_v14 = vadd.f32 %v2115_v13, %v2114_v10  ;;  %v2176_v15 = vpop.f32.mrb[11].mxu1  ;;  %v3213_v16 = vadd.f32 %v2281_v44, %v216_v9 }
 0x10b   :  { %v2177_v17 = vadd.f32 %v2176_v15, %v2175_v11 }
 0x10c   :  { %v221_v18 = vadd.f32 %v2116_v14, %v2009_v51  ;;  %v2117_v19 = vpop.f32.mrb[10].mxu0 }
 0x10d   :  { %v2178_v21 = vpop.f32.mrb[12].mxu1  ;;  %v2118_v22 = vpop.f32.mrb[11].mxu0  ;;  %v520_v23 = vadd.f32 %v2177_v17, %v2019_v20 }
 0x10e   :  { %v2119_v24 = vadd.f32 %v2118_v22, %v2117_v19  ;;  %v2179_v25 = vpop.f32.mrb[13].mxu1  ;;  %v3218_v26 = vadd.f32 %v325_v47, %v221_v18 }
 0x10f   :  { %v2180_v29 = vadd.f32 %v2179_v25, %v2178_v21 }
 0x110   :  { %v226_v30 = vadd.f32 %v2119_v24, %v2009_v51  ;;  %v2120_v31 = vpop.f32.mrb[12].mxu0 }
 0x111   :  { %v2181_v32 = vpop.f32.mrb[14].mxu1  ;;  %v2121_v33 = vpop.f32.mrb[13].mxu0  ;;  %v525_v34 = vadd.f32 %v2180_v29, %v2019_v20 }
 0x112   :  { %v2122_v36 = vadd.f32 %v2121_v33, %v2120_v31  ;;  %v2182_v37 = vpop.f32.mrb[15].mxu1  ;;  %v3220_v38 = vadd.f32 %v2284_v46, %v226_v30 }
 0x113   :  { %v2183_v39 = vadd.f32 %v2182_v37, %v2181_v32 }
 0x114   :  { %v231_v40 = vadd.f32 %v2122_v36, %v2009_v51  ;;  %v2123_v41 = vpop.f32.mrb[14].mxu0 }
 0x115   :  { %v2184_v42 = vpop.f32.mrb[16].mxu1  ;;  %v2124_v43 = vpop.f32.mrb[15].mxu0  ;;  %v530_v44 = vadd.f32 %v2183_v39, %v2019_v20 }
 0x116   :  { %v2125_v45 = vadd.f32 %v2124_v43, %v2123_v41  ;;  %v2185_v50 = vpop.f32.mrb[17].mxu1  ;;  %v3222_v47 = vadd.f32 %v335_v49, %v231_v40 }
 0x117   :  { %v2186_v52 = vadd.f32 %v2185_v50, %v2184_v42 }
 0x118   :  { %v236_v53 = vadd.f32 %v2125_v45, %v2009_v51  ;;  %v2302_v54 = vpop.f32.mrb[16].mxu0 }
 0x119   :  { %v2187_v56 = vpop.f32.mrb[18].mxu1  ;;  %v3224_v57 = vadd.f32 %v2302_v54, %v520_v23  ;;  %v619_v59 = vpop.f32.mrb[17].mxu0  ;;  %v535_v46 = vadd.f32 %v2186_v52, %v2019_v20 }
 0x11a   :  { %v2188_v60 = vpop.f32.mrb[19].mxu1  ;;  %v620_v61 = vadd.f32 %v619_v59, %v515_v55  ;;  %v3227_v62 = vadd.f32 %v3202_v48, %v236_v53 }
 0x11b   :  { %v2189_v0 = vadd.f32 %v2188_v60, %v2187_v56 }
 0x11c   :  { %v2305_v1 = vpop.f32.mrb[18].mxu0 }
 0x11d   :  { %v2190_v2 = vpop.f32.mrb[20].mxu1  ;;  %v3229_v3 = vadd.f32 %v2305_v1, %v530_v44  ;;  %v629_v49 = vpop.f32.mrb[19].mxu0  ;;  %v540_v4 = vadd.f32 %v2189_v0, %v2019_v20 }
 0x11e   :  { %v2191_v51 = vpop.f32.mrb[21].mxu1  ;;  %v3231_v5 = vadd.f32 %v629_v49, %v525_v34 }
 0x11f   :  { %v2192_v28 = vadd.f32 %v2191_v51, %v2190_v2 }
 0x120   :  { %v2308_v9 = vpop.f32.mrb[20].mxu0 }
 0x121   :  { %v2193_v10 = vpop.f32.mrb[22].mxu1  ;;  %v3233_v11 = vadd.f32 %v2308_v9, %v540_v4  ;;  %v639_v13 = vpop.f32.mrb[21].mxu0  ;;  %v545_v14 = vadd.f32 %v2192_v28, %v2019_v20 }
 0x122   :  { %v2194_v15 = vpop.f32.mrb[23].mxu1  ;;  %v3235_v48 = vadd.f32 %v639_v13, %v535_v46 }
 0x123   :  { %v2195_v17 = vadd.f32 %v2194_v15, %v2193_v10 }
 0x124   :  { %v2311_v18 = vpop.f32.mrb[22].mxu0 }
 0x125   :  { %v550_v19 = vadd.f32 %v2195_v17, %v2019_v20  ;;  %v721_v21 = vpop.f32.mrb[24].mxu1  ;;  %v649_v22 = vpop.f32.mrb[23].mxu0 }
 0x126   :  { %v727_v23 = vadd.f32 %v721_v21, %v3207_v58  ;;  %v3238_v24 = vadd.f32 %v649_v22, %v545_v14  ;;  %v2318_v25 = vpop.f32.mrb[25].mxu1 }
 0x127   :  { %v3240_v29 = vadd.f32 %v2311_v18, %v550_v19  ;;  %v724_v30 = vpop.f32.mrb[26].mxu1 }
 0x128   :  { %2562 = vtanh.f32 %v727_v23  ;;  %v2319_v31 = vpop.f32.mrb[27].mxu1  ;;  %v779_v32 = vpop.f32.mrb[24].mxu0  ;;  %v2033_v58 = vmul.f32 -1.442695, %v727_v23 }
 0x129   :  { %v785_v33 = vadd.f32 %v779_v32, %v620_v61  ;;  %v2326_v34 = vpop.f32.mrb[25].mxu0 }
 0x12a   :  { %v782_v36 = vpop.f32.mrb[26].mxu0 }
 0x12b   :  { %2564 = vtanh.f32 %v785_v33  ;;  %v2327_v37 = vpop.f32.mrb[27].mxu0  ;;  %v2034_v40 = vmul.f32 -1.442695, %v785_v33 }
 0x12c   :  { %2566 = vpow2.f32 %v2033_v58 }
 0x12d   :  { %2568 = vpow2.f32 %v2034_v40 }
 0x132   :  { %v2563_v39 = vpop.eup %2562 }
 0x133   :  { %795 = vrot.lane.b32.xlu0 %v2563_v39, %s2698_s7 }
 0x135   :  { %v2565_v20 = vpop.eup %2564 }
 0x136   :  { %v2567_v41 = vpop.eup %2566 }
 0x137   :  { %819 = vrot.lane.b32.xlu0 %v2565_v20, %s2698_s7  ;;  %v789_v42 = vadd.f32 1.0, %v2567_v41  ;;  %v2569_v43 = vpop.eup %2568 }
 0x138   :  { %v813_v44 = vadd.f32 1.0, %v2569_v43 }
 0x139   :  { %2570 = vrcp.f32 %v789_v42 }
 0x13a   :  { %2572 = vrcp.f32 %v813_v44 }
 0x143   :  { %v2571_v45 = vpop.eup %2570 }
 0x144   :  { %v2573_v53 = vpop.eup %2572  ;;  %v793_v56 = vmul.f32 0.0, %v2571_v45 }
 0x145   :  { %v817_v60 = vmul.f32 0.0, %v2573_v53 }
 0x1a5   :  { %v796_v50 = vpop.permute.xlu0 %795 }
 0x1a6   :  { %v798_v52 = vmul.f32 %v2571_v45, %v796_v50 }
 0x1a8   :  { %800 = vrot.lane.b32.xlu1 %v798_v52, %s2699_s19 }
 0x1a9   :  { %v820_v54 = vpop.permute.xlu0 %819 }
 0x1aa   :  { %v822_v55 = vmul.f32 %v2573_v53, %v820_v54 }
 0x1ac   :  { %824 = vrot.lane.b32.xlu1 %v822_v55, %s2699_s19 }
 0x21a   :  { %v801_v59 = vpop.permute.xlu1 %800 }
 0x21b   :  { %v3246_v46 = vadd.f32 %v801_v59, %v793_v56 }
 0x21d   :  { %2574 = vtanh.f32 %v3246_v46 }
 0x21e   :  { %v825_v61 = vpop.permute.xlu1 %824 }
 0x21f   :  { %v3249_v0 = vadd.f32 %v825_v61, %v817_v60 }
 0x221   :  { %2576 = vtanh.f32 %v3249_v0 }
 0x227   :  { %v2575_v1 = vpop.eup %2574 }
 0x228   :  { %806 = vrot.lane.b32.xlu0 %v2575_v1, %s2698_s7 }
 0x22b   :  { %v2577_v2 = vpop.eup %2576 }
 0x22c   :  { %830 = vrot.lane.b32.xlu1 %v2577_v2, %s2698_s7 }
 0x29a   :  { %v807_v49 = vpop.permute.xlu0 %806 }
 0x29b   :  { %v809_v4 = vmul.f32 %v2571_v45, %v807_v49 }
 0x29d   :  { %v836_v51 = vpack.c.bf16 %v809_v4, %v809_v4 }
 0x29e   :  { %v831_v28 = vpop.permute.xlu1 %830 }
 0x29f   :  { %v833_v9 = vmul.f32 %v2573_v53, %v831_v28  ;;  %838 = vrot.lane.b32.xlu0 %v836_v51, %s2699_s19 }
 0x2a1   :  { %v886_v10 = vpack.c.bf16 %v833_v9, %v833_v9 }
 0x2a3   :  { %888 = vrot.lane.b32.xlu1 %v886_v10, %s2699_s19 }
 0x311   :  { %v839_v13 = vpop.permute.xlu0 %838 }
 0x312   :  { %2333 = vmatmul.mubr.msk.bf16.vlgmr.msra.gmra.mrb[28].mxu1 %vm683_vm5, %v839_v13 }
 0x313   :  { %2345 = vmatpush3.bf16.msra.mxu1 %v3061_v6  ;;  %2348 = vmatprep.mubr.msk.bf16.mxu1 %vm2696_vm4, %v2695_v8 }
 0x314   :  { %2346 = vmatprep.subr.bf16.mxu1 %v2695_v8 }
 0x315   :  { %v889_v14 = vpop.permute.xlu1 %888 }
 0x316   :  { %2341 = vmatmul.mubr.msk.bf16.vlgmr.msra.gmra.mrb[28].mxu0 %vm683_vm5, %v889_v14 }
 0x317   :  { %2347 = vmatpush3.bf16.msra.mxu1 %v3084_v12  ;;  %2353 = vmatpush3.bf16.msra.mxu0 %v3135_v27 }
 0x318   :  { %2354 = vmatprep.subr.bf16.mxu0 %v2695_v8  ;;  %2356 = vmatprep.mubr.msk.bf16.mxu0 %vm2696_vm4, %v2695_v8 }
 0x319   :  { %2360 = vmatprep.subr.bf16.mxu1 %v2695_v8 }
 0x31b   :  { %2355 = vmatpush3.bf16.msra.mxu0 %v3161_v35 }
 0x31c   :  { %2368 = vmatprep.subr.bf16.mxu0 %v2695_v8 }
 0x3e5   :  { %v877_v15 = vpop.f32.mrb[28].mxu1 }
 0x3e6   :  { %v883_v17 = vadd.f32 %v877_v15, %v3209_v63  ;;  %v2334_v18 = vpop.f32.mrb[29].mxu1 }
 0x3e7   :  { %v880_v19 = vpop.f32.mrb[30].mxu1 }
 0x3e8   :  { %2578 = vtanh.f32 %v883_v17  ;;  %v2335_v21 = vpop.f32.mrb[31].mxu1  ;;  %v2037_v34 = vmul.f32 -1.442695, %v883_v17 }
 0x3e9   :  { %v927_v22 = vpop.f32.mrb[28].mxu0 }
 0x3ea   :  { %v933_v23 = vadd.f32 %v927_v22, %v3224_v57  ;;  %v2342_v25 = vpop.f32.mrb[29].mxu0 }
 0x3eb   :  { %v930_v30 = vpop.f32.mrb[30].mxu0 }
 0x3ec   :  { %2580 = vtanh.f32 %v933_v23  ;;  %v2343_v31 = vpop.f32.mrb[31].mxu0  ;;  %v2038_v63 = vmul.f32 -1.442695, %v933_v23 }
 0x3ed   :  { %2582 = vpow2.f32 %v2037_v34 }
 0x3ee   :  { %2584 = vpow2.f32 %v2038_v63 }
 0x3f2   :  { %v2579_v32 = vpop.eup %2578 }
 0x3f3   :  { %943 = vrot.lane.b32.xlu0 %v2579_v32, %s2698_s7 }
 0x3f6   :  { %v2581_v33 = vpop.eup %2580 }
 0x3f7   :  { %967 = vrot.lane.b32.xlu1 %v2581_v33, %s2698_s7  ;;  %v2583_v36 = vpop.eup %2582 }
 0x3f8   :  { %v937_v37 = vadd.f32 1.0, %v2583_v36  ;;  %v2585_v39 = vpop.eup %2584 }
 0x3f9   :  { %v961_v20 = vadd.f32 1.0, %v2585_v39 }
 0x3fa   :  { %2586 = vrcp.f32 %v937_v37 }
 0x3fb   :  { %2588 = vrcp.f32 %v961_v20 }
 0x404   :  { %v2587_v57 = vpop.eup %2586 }
 0x405   :  { %v2589_v41 = vpop.eup %2588  ;;  %v941_v44 = vmul.f32 %v2587_v57, %v3246_v46 }
 0x406   :  { %v965_v52 = vmul.f32 %v2589_v41, %v3249_v0 }
 0x465   :  { %v944_v58 = vpop.permute.xlu0 %943 }
 0x466   :  { %v946_v40 = vmul.f32 %v2587_v57, %v944_v58 }
 0x468   :  { %948 = vrot.lane.b32.xlu0 %v946_v40, %s2699_s19 }
 0x469   :  { %v968_v42 = vpop.permute.xlu1 %967 }
 0x46a   :  { %v970_v43 = vmul.f32 %v2589_v41, %v968_v42 }
 0x46c   :  { %972 = vrot.lane.b32.xlu1 %v970_v43, %s2699_s19 }
 0x4da   :  { %v949_v45 = vpop.permute.xlu0 %948 }
 0x4db   :  { %v3277_v50 = vadd.f32 %v949_v45, %v941_v44 }
 0x4dd   :  { %2590 = vtanh.f32 %v3277_v50 }
 0x4de   :  { %v973_v53 = vpop.permute.xlu1 %972 }
 0x4df   :  { %v3281_v54 = vadd.f32 %v973_v53, %v965_v52 }
 0x4e1   :  { %2592 = vtanh.f32 %v3281_v54 }
 0x4e7   :  { %v2591_v55 = vpop.eup %2590 }
 0x4e8   :  { %954 = vrot.lane.b32.xlu0 %v2591_v55, %s2698_s7 }
 0x4eb   :  { %v2593_v56 = vpop.eup %2592 }
 0x4ec   :  { %978 = vrot.lane.b32.xlu1 %v2593_v56, %s2698_s7 }
 0x55a   :  { %v955_v59 = vpop.permute.xlu0 %954 }
 0x55b   :  { %v957_v46 = vmul.f32 %v2587_v57, %v955_v59 }
 0x55d   :  { %v984_v60 = vpack.c.bf16 %v957_v46, %v957_v46 }
 0x55e   :  { %v979_v61 = vpop.permute.xlu1 %978 }
 0x55f   :  { %v981_v1 = vmul.f32 %v2589_v41, %v979_v61  ;;  %986 = vrot.lane.b32.xlu0 %v984_v60, %s2699_s19 }
 0x561   :  { %v1034_v2 = vpack.c.bf16 %v981_v1, %v981_v1 }
 0x563   :  { %1036 = vrot.lane.b32.xlu1 %v1034_v2, %s2699_s19 }
 0x5d1   :  { %v987_v0 = vpop.permute.xlu0 %986 }
 0x5d2   :  { %2349 = vmatmul.mubr.msk.bf16.vlgmr.msra.gmra.mrb[32].mxu1 %vm683_vm5, %v987_v0 }
 0x5d3   :  { %2361 = vmatpush3.bf16.msra.mxu1 %v3061_v6  ;;  %2364 = vmatprep.mubr.msk.bf16.mxu1 %vm2696_vm4, %v2695_v8 }
 0x5d4   :  { %2362 = vmatprep.subr.bf16.mxu1 %v2695_v8 }
 0x5d5   :  { %v1037_v49 = vpop.permute.xlu1 %1036 }
 0x5d6   :  { %2357 = vmatmul.mubr.msk.bf16.vlgmr.msra.gmra.mrb[32].mxu0 %vm683_vm5, %v1037_v49 }
 0x5d7   :  { %2363 = vmatpush3.bf16.msra.mxu1 %v3084_v12  ;;  %2369 = vmatpush3.bf16.msra.mxu0 %v3135_v27 }
 0x5d8   :  { %2370 = vmatprep.subr.bf16.mxu0 %v2695_v8  ;;  %2372 = vmatprep.mubr.msk.bf16.mxu0 %vm2696_vm4, %v2695_v8 }
 0x5d9   :  { %2376 = vmatprep.subr.bf16.mxu1 %v2695_v8 }
 0x5db   :  { %2371 = vmatpush3.bf16.msra.mxu0 %v3161_v35 }
 0x5dc   :  { %2384 = vmatprep.subr.bf16.mxu0 %v2695_v8 }
 0x6a5   :  { %v1025_v4 = vpop.f32.mrb[32].mxu1 }
 0x6a6   :  { %v1031_v51 = vadd.f32 %v1025_v4, %v3211_v7  ;;  %v2350_v28 = vpop.f32.mrb[33].mxu1 }
 0x6a7   :  { %v1028_v9 = vpop.f32.mrb[34].mxu1 }
 0x6a8   :  { %2594 = vtanh.f32 %v1031_v51  ;;  %v2351_v10 = vpop.f32.mrb[35].mxu1  ;;  %v2041_v22 = vmul.f32 -1.442695, %v1031_v51 }
 0x6a9   :  { %v1075_v13 = vpop.f32.mrb[32].mxu0 }
 0x6aa   :  { %v1081_v14 = vadd.f32 %v1075_v13, %v3231_v5  ;;  %v2358_v15 = vpop.f32.mrb[33].mxu0 }
 0x6ab   :  { %v1078_v17 = vpop.f32.mrb[34].mxu0 }
 0x6ac   :  { %2596 = vtanh.f32 %v1081_v14  ;;  %v2359_v18 = vpop.f32.mrb[35].mxu0  ;;  %v2042_v7 = vmul.f32 -1.442695, %v1081_v14 }
 0x6ad   :  { %2598 = vpow2.f32 %v2041_v22 }
 0x6ae   :  { %2600 = vpow2.f32 %v2042_v7 }
 0x6b2   :  { %v2595_v19 = vpop.eup %2594 }
 0x6b3   :  { %1091 = vrot.lane.b32.xlu0 %v2595_v19, %s2698_s7 }
 0x6b6   :  { %v2597_v21 = vpop.eup %2596 }
 0x6b7   :  { %1115 = vrot.lane.b32.xlu1 %v2597_v21, %s2698_s7  ;;  %v2599_v23 = vpop.eup %2598 }
 0x6b8   :  { %v1085_v25 = vadd.f32 1.0, %v2599_v23  ;;  %v2601_v30 = vpop.eup %2600 }
 0x6b9   :  { %v1109_v31 = vadd.f32 1.0, %v2601_v30 }
 0x6ba   :  { %2602 = vrcp.f32 %v1085_v25 }
 0x6bb   :  { %2604 = vrcp.f32 %v1109_v31 }
 0x6c4   :  { %v2603_v5 = vpop.eup %2602 }
 0x6c5   :  { %v2605_v34 = vpop.eup %2604  ;;  %v1089_v37 = vmul.f32 %v2603_v5, %v3277_v50 }
 0x6c6   :  { %v1113_v57 = vmul.f32 %v2605_v34, %v3281_v54 }
 0x725   :  { %v1092_v32 = vpop.permute.xlu0 %1091 }
 0x726   :  { %v1094_v33 = vmul.f32 %v2603_v5, %v1092_v32 }
 0x728   :  { %1096 = vrot.lane.b32.xlu0 %v1094_v33, %s2699_s19 }
 0x729   :  { %v1116_v63 = vpop.permute.xlu1 %1115 }
 0x72a   :  { %v1118_v36 = vmul.f32 %v2605_v34, %v1116_v63 }
 0x72c   :  { %1120 = vrot.lane.b32.xlu1 %v1118_v36, %s2699_s19 }
 0x79a   :  { %v1097_v39 = vpop.permute.xlu0 %1096 }
 0x79b   :  { %v3309_v20 = vadd.f32 %v1097_v39, %v1089_v37 }
 0x79d   :  { %2606 = vtanh.f32 %v3309_v20 }
 0x79e   :  { %v1121_v58 = vpop.permute.xlu1 %1120 }
 0x79f   :  { %v3313_v40 = vadd.f32 %v1121_v58, %v1113_v57 }
 0x7a1   :  { %2608 = vtanh.f32 %v3313_v40 }
 0x7a7   :  { %v2607_v41 = vpop.eup %2606 }
 0x7a8   :  { %1102 = vrot.lane.b32.xlu0 %v2607_v41, %s2698_s7 }
 0x7ab   :  { %v2609_v42 = vpop.eup %2608 }
 0x7ac   :  { %1126 = vrot.lane.b32.xlu1 %v2609_v42, %s2698_s7 }
 0x81a   :  { %v1103_v43 = vpop.permute.xlu0 %1102 }
 0x81b   :  { %v1105_v44 = vmul.f32 %v2603_v5, %v1103_v43 }
 0x81d   :  { %v1132_v45 = vpack.c.bf16 %v1105_v44, %v1105_v44 }
 0x81e   :  { %v1127_v50 = vpop.permute.xlu1 %1126 }
 0x81f   :  { %v1129_v52 = vmul.f32 %v2605_v34, %v1127_v50  ;;  %1134 = vrot.lane.b32.xlu0 %v1132_v45, %s2699_s19 }
 0x821   :  { %v1182_v53 = vpack.c.bf16 %v1129_v52, %v1129_v52 }
 0x823   :  { %1184 = vrot.lane.b32.xlu1 %v1182_v53, %s2699_s19 }
 0x891   :  { %v1135_v54 = vpop.permute.xlu0 %1134 }
 0x892   :  { %2365 = vmatmul.mubr.msk.bf16.vlgmr.msra.gmra.mrb[36].mxu1 %vm683_vm5, %v1135_v54 }
 0x893   :  { %2377 = vmatpush3.bf16.msra.mxu1 %v3061_v6  ;;  %2380 = vmatprep.mubr.msk.bf16.mxu1 %vm2696_vm4, %v2695_v8 }
 0x894   :  { %2378 = vmatprep.subr.bf16.mxu1 %v2695_v8 }
 0x895   :  { %v1185_v55 = vpop.permute.xlu1 %1184 }
 0x896   :  { %2373 = vmatmul.mubr.msk.bf16.vlgmr.msra.gmra.mrb[36].mxu0 %vm683_vm5, %v1185_v55 }
 0x897   :  { %2379 = vmatpush3.bf16.msra.mxu1 %v3084_v12  ;;  %2385 = vmatpush3.bf16.msra.mxu0 %v3135_v27 }
 0x898   :  { %2386 = vmatprep.subr.bf16.mxu0 %v2695_v8  ;;  %2388 = vmatprep.mubr.msk.bf16.mxu0 %vm2696_vm4, %v2695_v8 }
 0x899   :  { %2392 = vmatprep.subr.bf16.mxu1 %v2695_v8 }
 0x89b   :  { %2387 = vmatpush3.bf16.msra.mxu0 %v3161_v35 }
 0x89c   :  { %2400 = vmatprep.subr.bf16.mxu0 %v2695_v8 }
 0x965   :  { %v1173_v56 = vpop.f32.mrb[36].mxu1 }
 0x966   :  { %v1179_v59 = vadd.f32 %v1173_v56, %v3213_v16  ;;  %v2366_v46 = vpop.f32.mrb[37].mxu1 }
 0x967   :  { %v1176_v60 = vpop.f32.mrb[38].mxu1 }
 0x968   :  { %2610 = vtanh.f32 %v1179_v59  ;;  %v2367_v61 = vpop.f32.mrb[39].mxu1  ;;  %v2045_v9 = vmul.f32 -1.442695, %v1179_v59 }
 0x969   :  { %v1223_v1 = vpop.f32.mrb[36].mxu0 }
 0x96a   :  { %v1229_v2 = vadd.f32 %v1223_v1, %v3229_v3  ;;  %v2374_v0 = vpop.f32.mrb[37].mxu0 }
 0x96b   :  { %v1226_v49 = vpop.f32.mrb[38].mxu0 }
 0x96c   :  { %2612 = vtanh.f32 %v1229_v2  ;;  %v2375_v4 = vpop.f32.mrb[39].mxu0  ;;  %v2046_v16 = vmul.f32 -1.442695, %v1229_v2 }
 0x96d   :  { %2614 = vpow2.f32 %v2045_v9 }
 0x96e   :  { %2616 = vpow2.f32 %v2046_v16 }
 0x972   :  { %v2611_v51 = vpop.eup %2610 }
 0x973   :  { %1239 = vrot.lane.b32.xlu0 %v2611_v51, %s2698_s7 }
 0x976   :  { %v2613_v28 = vpop.eup %2612 }
 0x977   :  { %1263 = vrot.lane.b32.xlu1 %v2613_v28, %s2698_s7  ;;  %v2615_v10 = vpop.eup %2614 }
 0x978   :  { %v1233_v13 = vadd.f32 1.0, %v2615_v10  ;;  %v2617_v14 = vpop.eup %2616 }
 0x979   :  { %v1257_v15 = vadd.f32 1.0, %v2617_v14 }
 0x97a   :  { %2618 = vrcp.f32 %v1233_v13 }
 0x97b   :  { %2620 = vrcp.f32 %v1257_v15 }
 0x984   :  { %v2619_v3 = vpop.eup %2618 }
 0x985   :  { %v2621_v19 = vpop.eup %2620  ;;  %v1237_v7 = vmul.f32 %v2619_v3, %v3309_v20 }
 0x986   :  { %v1261_v30 = vmul.f32 %v2621_v19, %v3313_v40 }
 0x9e5   :  { %v1240_v17 = vpop.permute.xlu0 %1239 }
 0x9e6   :  { %v1242_v18 = vmul.f32 %v2619_v3, %v1240_v17 }
 0x9e8   :  { %1244 = vrot.lane.b32.xlu0 %v1242_v18, %s2699_s19 }
 0x9e9   :  { %v1264_v21 = vpop.permute.xlu1 %1263 }
 0x9ea   :  { %v1266_v22 = vmul.f32 %v2621_v19, %v1264_v21 }
 0x9ec   :  { %1268 = vrot.lane.b32.xlu1 %v1266_v22, %s2699_s19 }
 0xa5a   :  { %v1245_v23 = vpop.permute.xlu0 %1244 }
 0xa5b   :  { %v3341_v25 = vadd.f32 %v1245_v23, %v1237_v7  ;;  %v3388_v7 = vld [vmem:[%s3498_s3] sm:$0xff]  }
 0xa5d   :  { %2622 = vtanh.f32 %v3341_v25 }
 0xa5e   :  { %v1269_v31 = vpop.permute.xlu1 %1268 }
 0xa5f   :  { %v3345_v5 = vadd.f32 %v1269_v31, %v1261_v30 }
 0xa61   :  { %2624 = vtanh.f32 %v3345_v5 }
 0xa67   :  { %v2623_v32 = vpop.eup %2622 }
 0xa68   :  { %1250 = vrot.lane.b32.xlu0 %v2623_v32, %s2698_s7 }
 0xa6b   :  { %v2625_v33 = vpop.eup %2624 }
 0xa6c   :  { %1274 = vrot.lane.b32.xlu1 %v2625_v33, %s2698_s7 }
 0xada   :  { %v1251_v34 = vpop.permute.xlu0 %1250 }
 0xadb   :  { %v1253_v63 = vmul.f32 %v2619_v3, %v1251_v34 }
 0xadd   :  { %v1280_v36 = vpack.c.bf16 %v1253_v63, %v1253_v63 }
 0xade   :  { %v1275_v37 = vpop.permute.xlu1 %1274 }
 0xadf   :  { %v1277_v39 = vmul.f32 %v2621_v19, %v1275_v37  ;;  %1282 = vrot.lane.b32.xlu0 %v1280_v36, %s2699_s19 }
 0xae1   :  { %v1330_v20 = vpack.c.bf16 %v1277_v39, %v1277_v39 }
 0xae3   :  { %1332 = vrot.lane.b32.xlu1 %v1330_v20, %s2699_s19 }
 0xb51   :  { %v1283_v57 = vpop.permute.xlu0 %1282 }
 0xb52   :  { %2381 = vmatmul.mubr.msk.bf16.vlgmr.msra.gmra.mrb[40].mxu1 %vm683_vm5, %v1283_v57 }
 0xb53   :  { %2393 = vmatpush3.bf16.msra.mxu1 %v3061_v6  ;;  %2396 = vmatprep.mubr.msk.bf16.mxu1 %vm2696_vm4, %v2695_v8 }
 0xb54   :  { %2394 = vmatprep.subr.bf16.mxu1 %v2695_v8 }
 0xb55   :  { %v1333_v58 = vpop.permute.xlu1 %1332 }
 0xb56   :  { %2389 = vmatmul.mubr.msk.bf16.vlgmr.msra.gmra.mrb[40].mxu0 %vm683_vm5, %v1333_v58 }
 0xb57   :  { %2395 = vmatpush3.bf16.msra.mxu1 %v3084_v12  ;;  %2401 = vmatpush3.bf16.msra.mxu0 %v3135_v27 }
 0xb58   :  { %2402 = vmatprep.subr.bf16.mxu0 %v2695_v8  ;;  %2404 = vmatprep.mubr.msk.bf16.mxu0 %vm2696_vm4, %v2695_v8 }
 0xb59   :  { %2408 = vmatprep.subr.bf16.mxu1 %v2695_v8 }
 0xb5b   :  { %2403 = vmatpush3.bf16.msra.mxu0 %v3161_v35 }
 0xb5c   :  { %2416 = vmatprep.subr.bf16.mxu0 %v2695_v8 }
 0xc25   :  { %v1321_v6 = vpop.f32.mrb[40].mxu1 }
 0xc26   :  { %v1327_v40 = vadd.f32 %v1321_v6, %v3218_v26  ;;  %v2382_v41 = vpop.f32.mrb[41].mxu1 }
 0xc27   :  { %v1324_v42 = vpop.f32.mrb[42].mxu1 }
 0xc28   :  { %2626 = vtanh.f32 %v1327_v40  ;;  %v2383_v12 = vpop.f32.mrb[43].mxu1  ;;  %v2049_v55 = vmul.f32 -1.442695, %v1327_v40 }
 0xc29   :  { %v1371_v43 = vpop.f32.mrb[40].mxu0 }
 0xc2a   :  { %v1377_v44 = vadd.f32 %v1371_v43, %v3235_v48  ;;  %v2390_v45 = vpop.f32.mrb[41].mxu0 }
 0xc2b   :  { %v1374_v50 = vpop.f32.mrb[42].mxu0 }
 0xc2c   :  { %2628 = vtanh.f32 %v1377_v44  ;;  %v2391_v52 = vpop.f32.mrb[43].mxu0  ;;  %v2050_v26 = vmul.f32 -1.442695, %v1377_v44 }
 0xc2d   :  { %2630 = vpow2.f32 %v2049_v55 }
 0xc2e   :  { %2632 = vpow2.f32 %v2050_v26 }
 0xc32   :  { %v2627_v53 = vpop.eup %2626 }
 0xc33   :  { %1387 = vrot.lane.b32.xlu0 %v2627_v53, %s2698_s7 }
 0xc36   :  { %v2629_v54 = vpop.eup %2628 }
 0xc37   :  { %1411 = vrot.lane.b32.xlu1 %v2629_v54, %s2698_s7  ;;  %v2631_v56 = vpop.eup %2630 }
 0xc38   :  { %v1381_v59 = vadd.f32 1.0, %v2631_v56  ;;  %v2633_v46 = vpop.eup %2632 }
 0xc39   :  { %v1405_v60 = vadd.f32 1.0, %v2633_v46 }
 0xc3a   :  { %2634 = vrcp.f32 %v1381_v59 }
 0xc3b   :  { %2636 = vrcp.f32 %v1405_v60 }
 0xc44   :  { %v2635_v48 = vpop.eup %2634 }
 0xc45   :  { %v2637_v2 = vpop.eup %2636  ;;  %v1385_v4 = vmul.f32 %v2635_v48, %v3341_v25  ;;  %v3398_v25 = vld [vmem:[%s3498_s3 + $0x8] sm:$0xff]  }
 0xc46   :  { %v1409_v9 = vmul.f32 %v2637_v2, %v3345_v5 }
 0xca5   :  { %v1388_v61 = vpop.permute.xlu0 %1387 }
 0xca6   :  { %v1390_v1 = vmul.f32 %v2635_v48, %v1388_v61 }
 0xca8   :  { %1392 = vrot.lane.b32.xlu0 %v1390_v1, %s2699_s19 }
 0xca9   :  { %v1412_v0 = vpop.permute.xlu1 %1411 }
 0xcaa   :  { %v1414_v49 = vmul.f32 %v2637_v2, %v1412_v0 }
 0xcac   :  { %1416 = vrot.lane.b32.xlu1 %v1414_v49, %s2699_s19  ;;  %v2692_v49 = vld [vmem:[%s3499_s6] sm:$0xff]  }
 0xd1a   :  { %v1393_v51 = vpop.permute.xlu0 %1392 }
 0xd1b   :  { %v3373_v28 = vadd.f32 %v1393_v51, %v1385_v4  ;;  %v2693_v4 = vld [vmem:[%s3499_s6 + $0x8] sm:$0xff]  }
 0xd1d   :  { %2638 = vtanh.f32 %v3373_v28 }
 0xd1e   :  { %v1417_v16 = vpop.permute.xlu1 %1416 }
 0xd1f   :  { %v3377_v10 = vadd.f32 %v1417_v16, %v1409_v9 }
 0xd21   :  { %2640 = vtanh.f32 %v3377_v10 }
 0xd27   :  { %v2639_v13 = vpop.eup %2638 }
 0xd28   :  { %1398 = vrot.lane.b32.xlu0 %v2639_v13, %s2698_s7 }
 0xd2b   :  { %v2641_v14 = vpop.eup %2640 }
 0xd2c   :  { %1422 = vrot.lane.b32.xlu1 %v2641_v14, %s2698_s7 }
 0xd9a   :  { %v1399_v15 = vpop.permute.xlu0 %1398 }
 0xd9b   :  { %v1401_v3 = vmul.f32 %v2635_v48, %v1399_v15 }
 0xd9d   :  { %v1428_v17 = vpack.c.bf16 %v1401_v3, %v1401_v3 }
 0xd9e   :  { %v1423_v18 = vpop.permute.xlu1 %1422 }
 0xd9f   :  { %v1425_v19 = vmul.f32 %v2637_v2, %v1423_v18  ;;  %1430 = vrot.lane.b32.xlu0 %v1428_v17, %s2699_s19 }
 0xda1   :  { %v1478_v21 = vpack.c.bf16 %v1425_v19, %v1425_v19 }
 0xda3   :  { %1480 = vrot.lane.b32.xlu1 %v1478_v21, %s2699_s19 }
 0xe11   :  { %v1431_v22 = vpop.permute.xlu0 %1430 }
 0xe12   :  { %2397 = vmatmul.mubr.msk.bf16.vlgmr.msra.gmra.mrb[44].mxu1 %vm683_vm5, %v1431_v22 }
 0xe13   :  { %2409 = vmatpush3.bf16.msra.mxu1 %v3388_v7  ;;  %2412 = vmatprep.mubr.msk.bf16.mxu1 %vm2696_vm4, %v2695_v8 }
 0xe14   :  { %2410 = vmatprep.subr.bf16.mxu1 %v2695_v8 }
 0xe15   :  { %v1481_v23 = vpop.permute.xlu1 %1480 }
 0xe16   :  { %2405 = vmatmul.mubr.msk.bf16.vlgmr.msra.gmra.mrb[44].mxu0 %vm683_vm5, %v1481_v23 }
 0xe17   :  { %2411 = vmatpush3.bf16.msra.mxu1 %v3398_v25  ;;  %2417 = vmatpush3.bf16.msra.mxu0 %v3135_v27 }
 0xe18   :  { %2418 = vmatprep.subr.bf16.mxu0 %v2695_v8  ;;  %2420 = vmatprep.mubr.msk.bf16.mxu0 %vm2696_vm4, %v2695_v8 }
 0xe19   :  { %2424 = vmatprep.subr.bf16.mxu1 %v2695_v8 }
 0xe1b   :  { %2419 = vmatpush3.bf16.msra.mxu0 %v3161_v35 }
 0xe1c   :  { %2432 = vmatprep.subr.bf16.mxu0 %v2695_v8 }
 0xee5   :  { %v1469_v30 = vpop.f32.mrb[44].mxu1 }
 0xee6   :  { %v1475_v31 = vadd.f32 %v1469_v30, %v3220_v38  ;;  %v2398_v5 = vpop.f32.mrb[45].mxu1 }
 0xee7   :  { %v1472_v32 = vpop.f32.mrb[46].mxu1 }
 0xee8   :  { %2642 = vtanh.f32 %v1475_v31  ;;  %v2399_v33 = vpop.f32.mrb[47].mxu1  ;;  %v2053_v20 = vmul.f32 -1.442695, %v1475_v31 }
 0xee9   :  { %v1519_v34 = vpop.f32.mrb[44].mxu0 }
 0xeea   :  { %v1525_v27 = vadd.f32 %v1519_v34, %v3233_v11  ;;  %v2406_v63 = vpop.f32.mrb[45].mxu0 }
 0xeeb   :  { %v1522_v36 = vpop.f32.mrb[46].mxu0 }
 0xeec   :  { %2644 = vtanh.f32 %v1525_v27  ;;  %v2407_v37 = vpop.f32.mrb[47].mxu0  ;;  %v2054_v38 = vmul.f32 -1.442695, %v1525_v27 }
 0xeed   :  { %2646 = vpow2.f32 %v2053_v20 }
 0xeee   :  { %2648 = vpow2.f32 %v2054_v38 }
 0xef2   :  { %v2643_v39 = vpop.eup %2642 }
 0xef3   :  { %1535 = vrot.lane.b32.xlu0 %v2643_v39, %s2698_s7 }
 0xef6   :  { %v2645_v35 = vpop.eup %2644 }
 0xef7   :  { %1559 = vrot.lane.b32.xlu1 %v2645_v35, %s2698_s7  ;;  %v2647_v57 = vpop.eup %2646 }
 0xef8   :  { %v1529_v58 = vadd.f32 1.0, %v2647_v57  ;;  %v2649_v6 = vpop.eup %2648 }
 0xef9   :  { %v1553_v40 = vadd.f32 1.0, %v2649_v6 }
 0xefa   :  { %2650 = vrcp.f32 %v1529_v58 }
 0xefb   :  { %2652 = vrcp.f32 %v1553_v40 }
 0xf04   :  { %v2651_v11 = vpop.eup %2650 }
 0xf05   :  { %v2653_v12 = vpop.eup %2652  ;;  %v1533_v45 = vmul.f32 %v2651_v11, %v3373_v28 }
 0xf06   :  { %v1557_v53 = vmul.f32 %v2653_v12, %v3377_v10 }
 0xf65   :  { %v1536_v41 = vpop.permute.xlu0 %1535 }
 0xf66   :  { %v1538_v42 = vmul.f32 %v2651_v11, %v1536_v41 }
 0xf68   :  { %1540 = vrot.lane.b32.xlu0 %v1538_v42, %s2699_s19 }
 0xf69   :  { %v1560_v43 = vpop.permute.xlu1 %1559 }
 0xf6a   :  { %v1562_v44 = vmul.f32 %v2653_v12, %v1560_v43 }
 0xf6c   :  { %1564 = vrot.lane.b32.xlu1 %v1562_v44, %s2699_s19 }
 0xfda   :  { %v1541_v50 = vpop.permute.xlu0 %1540 }
 0xfdb   :  { %v3415_v52 = vadd.f32 %v1541_v50, %v1533_v45 }
 0xfdd   :  { %2654 = vtanh.f32 %v3415_v52 }
 0xfde   :  { %v1565_v54 = vpop.permute.xlu1 %1564 }
 0xfdf   :  { %v3419_v55 = vadd.f32 %v1565_v54, %v1557_v53 }
 0xfe1   :  { %2656 = vtanh.f32 %v3419_v55 }
 0xfe7   :  { %v2655_v26 = vpop.eup %2654 }
 0xfe8   :  { %1546 = vrot.lane.b32.xlu0 %v2655_v26, %s2698_s7 }
 0xfeb   :  { %v2657_v56 = vpop.eup %2656 }
 0xfec   :  { %1570 = vrot.lane.b32.xlu1 %v2657_v56, %s2698_s7 }
0x105a   :  { %v1547_v59 = vpop.permute.xlu0 %1546 }
0x105b   :  { %v1549_v46 = vmul.f32 %v2651_v11, %v1547_v59 }
0x105d   :  { %v1576_v60 = vpack.c.bf16 %v1549_v46, %v1549_v46 }
0x105e   :  { %v1571_v48 = vpop.permute.xlu1 %1570 }
0x105f   :  { %v1573_v61 = vmul.f32 %v2653_v12, %v1571_v48  ;;  %1578 = vrot.lane.b32.xlu0 %v1576_v60, %s2699_s19 }
0x1061   :  { %v1626_v1 = vpack.c.bf16 %v1573_v61, %v1573_v61 }
0x1063   :  { %1628 = vrot.lane.b32.xlu1 %v1626_v1, %s2699_s19 }
0x10d1   :  { %v1579_v2 = vpop.permute.xlu0 %1578 }
0x10d2   :  { %2413 = vmatmul.mubr.msk.bf16.vlgmr.msra.gmra.mrb[48].mxu1 %vm683_vm5, %v1579_v2 }
0x10d3   :  { %2425 = vmatpush3.bf16.msra.mxu1 %v3388_v7  ;;  %2428 = vmatprep.mubr.msk.bf16.mxu1 %vm2696_vm4, %v2695_v8 }
0x10d4   :  { %2426 = vmatprep.subr.bf16.mxu1 %v2695_v8 }
0x10d5   :  { %v1629_v0 = vpop.permute.xlu1 %1628 }
0x10d6   :  { %2421 = vmatmul.mubr.msk.bf16.vlgmr.msra.gmra.mrb[48].mxu0 %vm683_vm5, %v1629_v0 }
0x10d7   :  { %2427 = vmatpush3.bf16.msra.mxu1 %v3398_v25  ;;  %2433 = vmatpush3.bf16.msra.mxu0 %v2692_v49 }
0x10d8   :  { %2434 = vmatprep.subr.bf16.mxu0 %v2695_v8  ;;  %2436 = vmatprep.mubr.msk.bf16.mxu0 %vm2696_vm4, %v2695_v8 }
0x10d9   :  { %2440 = vmatprep.subr.bf16.mxu1 %v2695_v8 }
0x10db   :  { %2435 = vmatpush3.bf16.msra.mxu0 %v2693_v4 }
0x10dc   :  { %2448 = vmatprep.subr.bf16.mxu0 %v2695_v8 }
0x11a5   :  { %v1617_v51 = vpop.f32.mrb[48].mxu1 }
0x11a6   :  { %v1623_v28 = vadd.f32 %v1617_v51, %v3222_v47  ;;  %v2414_v9 = vpop.f32.mrb[49].mxu1 }
0x11a7   :  { %v1620_v16 = vpop.f32.mrb[50].mxu1 }
0x11a8   :  { %2658 = vtanh.f32 %v1623_v28  ;;  %v2415_v10 = vpop.f32.mrb[51].mxu1  ;;  %v2057_v21 = vmul.f32 -1.442695, %v1623_v28 }
0x11a9   :  { %v1667_v13 = vpop.f32.mrb[48].mxu0 }
0x11aa   :  { %v1673_v14 = vadd.f32 %v1667_v13, %v3238_v24  ;;  %v2422_v15 = vpop.f32.mrb[49].mxu0 }
0x11ab   :  { %v1670_v3 = vpop.f32.mrb[50].mxu0  ;;  %v2558_v15 = vld [vmem:[%s3502_s8] sm:$0xff]  }
0x11ac   :  { %2660 = vtanh.f32 %v1673_v14  ;;  %v2423_v17 = vpop.f32.mrb[51].mxu0  ;;  %v2058_v47 = vmul.f32 -1.442695, %v1673_v14  ;;  %v2559_v3 = vld [vmem:[%s3502_s8 + $0x10] sm:$0xff]  }
0x11ad   :  { %2662 = vpow2.f32 %v2057_v21  ;;  %v2560_v17 = vld [vmem:[%s3502_s8 + $0x8] sm:$0xff]   ;;  %v2561_v21 = vld [vmem:[%s3502_s8 + $0x18] sm:$0xff]  }
0x11ae   :  { %2664 = vpow2.f32 %v2058_v47 }
0x11b2   :  { %v2659_v18 = vpop.eup %2658 }
0x11b3   :  { %1683 = vrot.lane.b32.xlu0 %v2659_v18, %s2698_s7 }
0x11b6   :  { %v2661_v19 = vpop.eup %2660 }
0x11b7   :  { %1707 = vrot.lane.b32.xlu1 %v2661_v19, %s2698_s7  ;;  %v2663_v22 = vpop.eup %2662 }
0x11b8   :  { %v1677_v7 = vadd.f32 1.0, %v2663_v22  ;;  %v2665_v23 = vpop.eup %2664 }
0x11b9   :  { %v1701_v25 = vadd.f32 1.0, %v2665_v23 }
0x11ba   :  { %2666 = vrcp.f32 %v1677_v7 }
0x11bb   :  { %2668 = vrcp.f32 %v1701_v25 }
0x11c4   :  { %v2667_v24 = vpop.eup %2666 }
0x11c5   :  { %v2669_v5 = vpop.eup %2668  ;;  %v1681_v34 = vmul.f32 %v2667_v24, %v3415_v52 }
0x11c6   :  { %v1705_v36 = vmul.f32 %v2669_v5, %v3419_v55 }
0x1225   :  { %v1684_v30 = vpop.permute.xlu0 %1683 }
0x1226   :  { %v1686_v31 = vmul.f32 %v2667_v24, %v1684_v30 }
0x1228   :  { %1688 = vrot.lane.b32.xlu0 %v1686_v31, %s2699_s19 }
0x1229   :  { %v1708_v32 = vpop.permute.xlu1 %1707 }
0x122a   :  { %v1710_v33 = vmul.f32 %v2669_v5, %v1708_v32 }
0x122c   :  { %1712 = vrot.lane.b32.xlu1 %v1710_v33, %s2699_s19 }
0x129a   :  { %v1689_v27 = vpop.permute.xlu0 %1688 }
0x129b   :  { %v1691_v63 = vadd.f32 %v1689_v27, %v1681_v34  ;;  %v2069_v27 = vld [vmem:[%s3503_s9] ss:$0 sm:$0xff] }
0x129d   :  { %2670 = vtanh.f32 %v1691_v63 }
0x129e   :  { %v1713_v37 = vpop.permute.xlu1 %1712 }
0x129f   :  { %v1715_v39 = vadd.f32 %v1713_v37, %v1705_v36 }
0x12a1   :  { %2672 = vtanh.f32 %v1715_v39 }
0x12a7   :  { %v2671_v35 = vpop.eup %2670 }
0x12a8   :  { %1694 = vrot.lane.b32.xlu0 %v2671_v35, %s2698_s7 }
0x12ab   :  { %v2673_v20 = vpop.eup %2672 }
0x12ac   :  { %1718 = vrot.lane.b32.xlu1 %v2673_v20, %s2698_s7 }
0x131a   :  { %v1695_v38 = vpop.permute.xlu0 %1694 }
0x131b   :  { %v1697_v57 = vmul.f32 %v2667_v24, %v1695_v38 }
0x131d   :  { %v1724_v58 = vpack.c.bf16 %v1697_v57, %v1697_v57 }
0x131e   :  { %v1719_v6 = vpop.permute.xlu1 %1718 }
0x131f   :  { %v1721_v40 = vmul.f32 %v2669_v5, %v1719_v6  ;;  %1726 = vrot.lane.b32.xlu0 %v1724_v58, %s2699_s19 }
0x1321   :  { %v1774_v11 = vpack.c.bf16 %v1721_v40, %v1721_v40 }
0x1323   :  { %1776 = vrot.lane.b32.xlu1 %v1774_v11, %s2699_s19 }
0x1391   :  { %v1727_v41 = vpop.permute.xlu0 %1726 }
0x1392   :  { %2429 = vmatmul.mubr.msk.bf16.vlgmr.msra.gmra.mrb[52].mxu1 %vm683_vm5, %v1727_v41 }
0x1393   :  { %2444 = vmatprep.mubr.msk.bf16.mxu1 %vm2696_vm4, %v2695_v8  ;;  %2441 = vmatpush3.bf16.msra.mxu1 %v2559_v3 }
0x1394   :  { %2442 = vmatprep.subr.bf16.mxu1 %v2695_v8 }
0x1395   :  { %v1777_v42 = vpop.permute.xlu1 %1776 }
0x1396   :  { %2437 = vmatmul.mubr.msk.bf16.vlgmr.msra.gmra.mrb[52].mxu0 %vm683_vm5, %v1777_v42 }
0x1397   :  { %2452 = vmatprep.mubr.msk.bf16.mxu0 %vm2696_vm4, %v2695_v8  ;;  %2449 = vmatpush3.bf16.msra.mxu0 %v2558_v15 }
0x1398   :  { %2450 = vmatprep.subr.bf16.mxu0 %v2695_v8  ;;  %2443 = vmatpush3.bf16.msra.mxu1 %v2561_v21 }
0x139b   :  { %2451 = vmatpush3.bf16.msra.mxu0 %v2560_v17 }
0x1465   :  { %v1765_v12 = vpop.f32.mrb[52].mxu1 }
0x1466   :  { %v1771_v43 = vadd.f32 %v1765_v12, %v3227_v62  ;;  %v2430_v44 = vpop.f32.mrb[53].mxu1 }
0x1467   :  { %v1768_v45 = vpop.f32.mrb[54].mxu1 }
0x1468   :  { %2674 = vtanh.f32 %v1771_v43  ;;  %v2431_v50 = vpop.f32.mrb[55].mxu1  ;;  %v2061_v46 = vmul.f32 -1.442695, %v1771_v43 }
0x1469   :  { %v1815_v52 = vpop.f32.mrb[52].mxu0 }
0x146a   :  { %v1821_v53 = vadd.f32 %v1815_v52, %v3240_v29  ;;  %v2438_v54 = vpop.f32.mrb[53].mxu0 }
0x146b   :  { %v1818_v55 = vpop.f32.mrb[54].mxu0 }
0x146c   :  { %2676 = vtanh.f32 %v1821_v53  ;;  %v2439_v26 = vpop.f32.mrb[55].mxu0  ;;  %v2062_v62 = vmul.f32 -1.442695, %v1821_v53 }
0x146d   :  { %2678 = vpow2.f32 %v2061_v46 }
0x146e   :  { %2680 = vpow2.f32 %v2062_v62 }
0x1472   :  { %v2675_v56 = vpop.eup %2674 }
0x1473   :  { %1831 = vrot.lane.b32.xlu0 %v2675_v56, %s2698_s7 }
0x1476   :  { %v2677_v59 = vpop.eup %2676 }
0x1477   :  { %1855 = vrot.lane.b32.xlu1 %v2677_v59, %s2698_s7  ;;  %v2679_v60 = vpop.eup %2678 }
0x1478   :  { %v1825_v48 = vadd.f32 1.0, %v2679_v60  ;;  %v2681_v61 = vpop.eup %2680 }
0x1479   :  { %v1849_v1 = vadd.f32 1.0, %v2681_v61 }
0x147a   :  { %2682 = vrcp.f32 %v1825_v48 }
0x147b   :  { %2684 = vrcp.f32 %v1849_v1 }
0x1484   :  { %v2683_v29 = vpop.eup %2682 }
0x1485   :  { %v2685_v49 = vpop.eup %2684  ;;  %v1829_v28 = vmul.f32 %v2683_v29, %v1691_v63 }
0x1486   :  { %v1853_v10 = vmul.f32 %v2685_v49, %v1715_v39 }
0x14e5   :  { %v1832_v2 = vpop.permute.xlu0 %1831 }
0x14e6   :  { %v1834_v0 = vmul.f32 %v2683_v29, %v1832_v2 }
0x14e8   :  { %1836 = vrot.lane.b32.xlu0 %v1834_v0, %s2699_s19 }
0x14e9   :  { %v1856_v4 = vpop.permute.xlu1 %1855 }
0x14ea   :  { %v1858_v51 = vmul.f32 %v2685_v49, %v1856_v4 }
0x14ec   :  { %1860 = vrot.lane.b32.xlu1 %v1858_v51, %s2699_s19 }
0x155a   :  { %v1837_v9 = vpop.permute.xlu0 %1836 }
0x155b   :  { %v1839_v16 = vadd.f32 %v1837_v9, %v1829_v28 }
0x155d   :  { %2686 = vtanh.f32 %v1839_v16 }
0x155e   :  { %v1861_v13 = vpop.permute.xlu1 %1860 }
0x155f   :  { %v1863_v14 = vadd.f32 %v1861_v13, %v1853_v10 }
0x1561   :  { %2688 = vtanh.f32 %v1863_v14 }
0x1567   :  { %v2687_v18 = vpop.eup %2686 }
0x1568   :  { %1842 = vrot.lane.b32.xlu0 %v2687_v18, %s2698_s7 }
0x156b   :  { %v2689_v19 = vpop.eup %2688 }
0x156c   :  { %1866 = vrot.lane.b32.xlu1 %v2689_v19, %s2698_s7 }
0x15da   :  { %v1843_v47 = vpop.permute.xlu0 %1842 }
0x15db   :  { %v1845_v22 = vmul.f32 %v2683_v29, %v1843_v47 }
0x15dd   :  { %v1870_v7 = vpack.c.bf16 %v1845_v22, %v1845_v22 }
0x15de   :  { %v1867_v23 = vpop.permute.xlu1 %1866 }
0x15df   :  { %v1869_v25 = vmul.f32 %v2685_v49, %v1867_v23  ;;  %1939 = vrot.lane.b32.xlu1 %v1870_v7, %s2699_s19 }
0x15e1   :  { %v1875_v24 = vpack.c.bf16 %v1869_v25, %v1869_v25 }
0x15e3   :  { %1881 = vrot.lane.b32.xlu0 %v1875_v24, %s2699_s19 }
0x1651   :  { %v1940_v8 = vpop.permute.xlu1 %1939 }
0x1652   :  { %2453 = vmatmul.mubr.msk.bf16.vlgmr.msra.gmra.mrb[56].mxu0 %vm683_vm5, %v1940_v8 }
0x1655   :  { %v1882_v30 = vpop.permute.xlu0 %1881 }
0x1656   :  { %2445 = vmatmul.mubr.msk.bf16.vlgmr.msra.gmra.mrb[56].mxu1 %vm683_vm5, %v1882_v30 }
0x1725   :  { %v1990_v31 = vpop.f32.mrb[56].mxu0 }
0x1726   :  { %v2454_v5 = vpop.f32.mrb[57].mxu0 }
0x1727   :  { %v1993_v32 = vpop.f32.mrb[58].mxu0 }
0x1728   :  { %v2455_v33 = vpop.f32.mrb[59].mxu0 }
0x1729   :  { %v1932_v34 = vpop.f32.mrb[56].mxu1 }
0x172a   :  { %v1991_v63 = vadd.f32 %v1990_v31, %v1932_v34  ;;  %v2446_v36 = vpop.f32.mrb[57].mxu1 }
0x172b   :  { %v1935_v37 = vpop.f32.mrb[58].mxu1 }
0x172c   :  { %v2003_v39 = vadd.f32 %v2069_v27, %v1991_v63  ;;  %v2447_v35 = vpop.f32.mrb[59].mxu1 }
0x172e   :  { %2004 = vst [vmem:[%s3504_s10] sm:$0xff] %v2003_v39 }

</bundles_post_ra>
